<compile_context>
chip_gen: v5e
topology: v5e:2x2
jax: 0.10.0
libtpu: 0.0.40
codegen_flags: <defaults>
</compile_context>

<pallas_src>
import math
import numpy as np
import jax
import jax.numpy as jnp
from jax import lax
from jax.experimental import pallas as pl
from jax.experimental.pallas import tpu as pltpu


def _round_up(x, m):
    return ((x + m - 1) // m) * m


def lstm_cls_kernel(x_ref, lens_ref, wih_ref, whh_ref, b_ref, wc_ref, bc_ref,
                    out_ref, gx_scr, hs_scr):
    """LSTM recurrence + masking + classifier, all in VMEM.

    x_ref:    (T, Bp, F)       bf16  time-major padded input features
    lens_ref: (Bp, 1)          int32 valid lengths per sequence (0 for padded rows)
    wih_ref:  (F, 4*Hp)        bf16  input->gates weights, gate column order (i, f, o, g)
    whh_ref:  (Hp, 4*Hp)       bf16  hidden->gates weights, same column order
    b_ref:    (1, 4*Hp)        f32   combined LSTM bias (b_ih + b_hh)
    wc_ref:   (Hp, Rp)         bf16  classifier weights (zero-padded rows/cols)
    bc_ref:   (1, Rp)          f32   classifier bias (zero-padded lanes)
    out_ref:  (T, Bp, Rp)      f32   logits (padded time positions == classifier bias)
    gx_scr:   (T, Bp, 4*Hp)    bf16  hoisted input projection (bias added in-step, f32)
    hs_scr:   (T, Bp, Hp)      f32   per-step hidden states, already length-masked
    """
    T, B, F = x_ref.shape
    Hp, G4 = whh_ref.shape
    Rp = out_ref.shape[2]

    # ---- Hoisted input projection: one MXU call for all (T*B) rows, stored bf16 ----
    x_flat = x_ref[...].reshape(T * B, F)                                   # bf16
    gx = jnp.dot(x_flat, wih_ref[...],
                 preferred_element_type=jnp.float32)                        # (T*B, 4Hp) f32
    gx_scr[...] = gx.reshape(T, B, G4).astype(gx_scr.dtype)

    # Loop-invariant values hoisted once: whh stays resident across every step.
    whh = whh_ref[...]                                                      # (Hp, 4Hp) bf16
    bias = b_ref[...]                                                       # (1, 4Hp) f32
    lens = lens_ref[...]                                                    # (Bp, 1) int32
    # Gate column order is (i, f, o, g): sigmoid covers lanes [0, 3Hp), tanh covers
    # [3Hp, 4Hp).  Compute both over the full 128-lane gate vreg and pick per lane.
    lane = lax.broadcasted_iota(jnp.int32, (B, G4), 1)
    sig_mask = lane < 3 * Hp

    # ---- Serial recurrence: only h @ whh + gate math on the critical path ----
    def step(t, carry):
        h, c = carry                                                        # f32 (B, Hp)
        gates = (gx_scr[t].astype(jnp.float32) + bias
                 + jnp.dot(h.astype(whh.dtype), whh,
                           preferred_element_type=jnp.float32))             # (B, 4Hp) f32
        act = jnp.where(sig_mask, jax.nn.sigmoid(gates), jnp.tanh(gates))
        i_g = act[:, 0 * Hp:1 * Hp]
        f_g = act[:, 1 * Hp:2 * Hp]
        o_g = act[:, 2 * Hp:3 * Hp]
        g_g = act[:, 3 * Hp:4 * Hp]

        c_new = f_g * c + i_g * g_g
        h_new = o_g * jnp.tanh(c_new)
        # Fold the pack/pad length mask into the recurrence (no epilogue mask pass).
        hs_scr[t] = jnp.where(lens > t, h_new, 0.0)
        return (h_new, c_new)

    h0 = jnp.zeros((B, Hp), jnp.float32)
    c0 = jnp.zeros((B, Hp), jnp.float32)
    # T is static and small here; cap the unroll (e.g. unroll=8) for production T.
    lax.fori_loop(0, T, step, (h0, c0), unroll=True)

    # ---- Epilogue: one classifier matmul, one lane-dense (Rp = 128) store ----
    hs = hs_scr[...].reshape(T * B, Hp)
    logits = (jnp.dot(hs.astype(wc_ref.dtype), wc_ref[...],
                      preferred_element_type=jnp.float32)
              + bc_ref[...])                                                # (T*B, Rp) f32
    out_ref[...] = logits.reshape(T, B, Rp)                                 # single unmasked store


def entity_linker_forward(x, lens, w_ih, w_hh, b, w_cls, b_cls):
    """x: (B, T, F) float32 batch-first (PyTorch layout); lens: length-B concrete ints.

    w_ih: (F, 4H), w_hh: (H, 4H), b: (1, 4H)  with PyTorch gate order (i, f, g, o).
    w_cls: (H, R), b_cls: (1, R).
    Returns (B, max(lens), R) logits, matching the PyTorch module.
    """
    B, T, F = x.shape
    H = w_hh.shape[0]
    R = w_cls.shape[1]

    lens_np = np.asarray(lens).astype(np.int32)
    t_out = int(lens_np.max())            # pad_packed_sequence pads to max(lens)

    B_pad = _round_up(B, 8)               # fill sublanes
    H_pad = _round_up(H, 32)              # 4*H_pad is a multiple of 128 (H=32 -> no padding)
    R_pad = _round_up(R, 128)             # lane-dense output store

    def split_gates(w):                   # (..., 4H) -> (i, f, g, o) blocks of width H
        return [w[..., k * H:(k + 1) * H] for k in range(4)]

    def pad_last(w, new):
        return jnp.pad(w, [(0, 0)] * (w.ndim - 1) + [(0, new - w.shape[-1])])

    # Reorder gate columns to (i, f, o, g); per-gate padding is a no-op at H=32.
    def repack(w):                        # works for w_ih (F,4H), w_hh (H,4H), b (1,4H)
        gi, gf, gg, go = split_gates(w)
        return jnp.concatenate([pad_last(gi, H_pad), pad_last(gf, H_pad),
                                pad_last(go, H_pad), pad_last(gg, H_pad)], axis=-1)

    wih_p = repack(w_ih)                                                    # (F, 4*H_pad)
    whh_p = jnp.pad(repack(w_hh), ((0, H_pad - H), (0, 0)))                 # (H_pad, 4*H_pad)
    b_p = repack(b)                                                         # (1, 4*H_pad)
    wc_p = jnp.pad(w_cls, ((0, H_pad - H), (0, R_pad - R)))                 # (H_pad, R_pad)
    bc_p = pad_last(b_cls, R_pad)                                           # (1, R_pad)

    # Time-major input, only the needed t_out steps, batch padded to a full sublane tile.
    x_tm = jnp.transpose(x[:, :t_out, :], (1, 0, 2))                        # (t_out, B, F)
    x_tm = jnp.pad(x_tm, ((0, 0), (0, B_pad - B), (0, 0)))                  # (t_out, B_pad, F)

    lens_p = jnp.zeros((B_pad, 1), jnp.int32).at[:B, 0].set(
        jnp.asarray(lens_np, jnp.int32))

    # bf16 operands for the MXU; biases / state / gate math stay f32.
    x_bf = x_tm.astype(jnp.bfloat16)
    wih_bf = wih_p.astype(jnp.bfloat16)
    whh_bf = whh_p.astype(jnp.bfloat16)
    wc_bf = wc_p.astype(jnp.bfloat16)

    out_tm = pl.pallas_call(
        lstm_cls_kernel,
        out_shape=jax.ShapeDtypeStruct((t_out, B_pad, R_pad), jnp.float32),
        in_specs=[pl.BlockSpec(memory_space=pltpu.MemorySpace.VMEM)] * 7,
        out_specs=pl.BlockSpec(memory_space=pltpu.MemorySpace.VMEM),
        scratch_shapes=[
            pltpu.VMEM((t_out, B_pad, 4 * H_pad), jnp.bfloat16),  # hoisted input projection
            pltpu.VMEM((t_out, B_pad, H_pad), jnp.float32),       # masked per-step hidden states
        ],
    )(x_bf, lens_p, wih_bf, whh_bf, b_p, wc_bf, bc_p)

    out = jnp.transpose(out_tm, (1, 0, 2))[:B, :, :R]                       # (B, t_out, R)
    return out


def entity_linker_reference(x, lens, w_ih, w_hh, b, w_cls, b_cls):
    """Pure-JAX f32 reference replicating the PyTorch forward for verification."""
    B, T, F = x.shape
    H = w_hh.shape[0]
    lens_arr = jnp.asarray(np.asarray(lens), jnp.int32).reshape(B, 1)

    def cell(carry, x_t_and_t):
        h, c = carry
        x_t, t = x_t_and_t
        gates = x_t @ w_ih + h @ w_hh + b
        i_g = jax.nn.sigmoid(gates[:, 0 * H:1 * H])
        f_g = jax.nn.sigmoid(gates[:, 1 * H:2 * H])
        g_g = jnp.tanh(gates[:, 2 * H:3 * H])
        o_g = jax.nn.sigmoid(gates[:, 3 * H:4 * H])
        c_new = f_g * c + i_g * g_g
        h_new = o_g * jnp.tanh(c_new)
        h_masked = jnp.where(lens_arr > t, h_new, 0.0)
        return (h_new, c_new), h_masked

    x_tm = jnp.transpose(x, (1, 0, 2))
    init = (jnp.zeros((B, H), jnp.float32), jnp.zeros((B, H), jnp.float32))
    _, hs = lax.scan(cell, init, (x_tm, jnp.arange(T)))
    hs = jnp.transpose(hs, (1, 0, 2))                                       # (B, T, H)
    logits = hs @ w_cls + b_cls
    t_out = int(np.max(np.asarray(lens)))
    return logits[:, :t_out, :]


if __name__ == "__main__":
    # Small shapes consistent with the module: batch=2, max seq=8, feature=16,
    # hidden=32, roleset=5.
    B, T, F, H, R = 2, 8, 16, 32, 5
    lens = np.array([8, 5], dtype=np.int32)

    key = jax.random.PRNGKey(0)
    kx, k1, k2, k3, k4, k5, k6 = jax.random.split(key, 7)

    x = jax.random.normal(kx, (B, T, F), dtype=jnp.float32)

    s = 1.0 / math.sqrt(H)
    w_ih = jax.random.uniform(k1, (F, 4 * H), jnp.float32, -s, s)
    w_hh = jax.random.uniform(k2, (H, 4 * H), jnp.float32, -s, s)
    b_ih = jax.random.uniform(k3, (1, 4 * H), jnp.float32, -s, s)
    b_hh = jax.random.uniform(k4, (1, 4 * H), jnp.float32, -s, s)
    b = b_ih + b_hh                                           # combined LSTM bias
    w_cls = jax.random.uniform(k5, (H, R), jnp.float32, -s, s)
    b_cls = jax.random.uniform(k6, (1, R), jnp.float32, -s, s)

    out = entity_linker_forward(x, lens, w_ih, w_hh, b, w_cls, b_cls)
    out = jax.block_until_ready(out)

    ref = entity_linker_reference(x, lens, w_ih, w_hh, b, w_cls, b_cls)
    ref = jax.block_until_ready(ref)

    # bf16 MXU operands / bf16 gx scratch in the kernel vs. f32 reference -> relaxed tolerance.
    np.testing.assert_allclose(np.asarray(out), np.asarray(ref),
                               rtol=2e-2, atol=2e-2)
    print("KERNEL_OK")
</pallas_src>

<mosaic_0001>
module attributes {stable_mosaic.version = 11 : i64} {
  func.func @lstm_cls_kernel(%arg0: memref<8x8x16xbf16, #tpu.memory_space<vmem>>, %arg1: memref<8x1xi32, #tpu.memory_space<vmem>>, %arg2: memref<16x128xbf16, #tpu.memory_space<vmem>>, %arg3: memref<32x128xbf16, #tpu.memory_space<vmem>>, %arg4: memref<1x128xf32, #tpu.memory_space<vmem>>, %arg5: memref<32x128xbf16, #tpu.memory_space<vmem>>, %arg6: memref<1x128xf32, #tpu.memory_space<vmem>>, %arg7: memref<8x8x128xf32, #tpu.memory_space<vmem>>, %arg8: memref<8x8x128xbf16, #tpu.memory_space<vmem>>, %arg9: memref<8x8x32xf32, #tpu.memory_space<vmem>>) attributes {dimension_semantics = [], scalar_prefetch = 0 : i64, scratch_operands = 2 : i64, tpu.core_type = #tpu.core_type<tc>} {
    %c0 = arith.constant 0 : index
    %c0_0 = arith.constant 0 : index
    %c0_1 = arith.constant 0 : index
    %0 = vector.load %arg0[%c0, %c0_0, %c0_1] : memref<8x8x16xbf16, #tpu.memory_space<vmem>>, vector<8x8x16xbf16>
    %1 = vector.shape_cast %0 : vector<8x8x16xbf16> to vector<64x16xbf16>
    %c0_2 = arith.constant 0 : index
    %c0_3 = arith.constant 0 : index
    %2 = vector.load %arg2[%c0_2, %c0_3] : memref<16x128xbf16, #tpu.memory_space<vmem>>, vector<16x128xbf16>
    %cst = arith.constant dense<0.000000e+00> : vector<64x128xf32>
    %3 = tpu.matmul %1, %2, %cst {dimension_numbers = #tpu.dot_dimension_numbers<[1], [0], [0], [1], [0, 0, 1, 1], [], []>} : vector<64x16xbf16>, vector<16x128xbf16>, vector<64x128xf32> -> vector<64x128xf32>
    %4 = vector.shape_cast %3 : vector<64x128xf32> to vector<8x8x128xf32>
    %5 = arith.truncf %4 : vector<8x8x128xf32> to vector<8x8x128xbf16>
    %c0_4 = arith.constant 0 : index
    %c0_5 = arith.constant 0 : index
    %c0_6 = arith.constant 0 : index
    %6 = vector.load %arg8[%c0_4, %c0_5, %c0_6] : memref<8x8x128xbf16, #tpu.memory_space<vmem>>, vector<8x8x128xbf16>
    tpu.vector_store %arg8[%c0_4, %c0_5, %c0_6], %5 {strides = array<i32>} : memref<8x8x128xbf16, #tpu.memory_space<vmem>>, vector<8x8x128xbf16>,
    %c0_7 = arith.constant 0 : index
    %c0_8 = arith.constant 0 : index
    %7 = vector.load %arg3[%c0_7, %c0_8] : memref<32x128xbf16, #tpu.memory_space<vmem>>, vector<32x128xbf16>
    %c0_9 = arith.constant 0 : index
    %c0_10 = arith.constant 0 : index
    %8 = vector.load %arg4[%c0_9, %c0_10] : memref<1x128xf32, #tpu.memory_space<vmem>>, vector<1x128xf32>
    %c0_11 = arith.constant 0 : index
    %c0_12 = arith.constant 0 : index
    %9 = vector.load %arg1[%c0_11, %c0_12] : memref<8x1xi32, #tpu.memory_space<vmem>>, vector<8x1xi32>
    %10 = tpu.iota {dimensions = array<i32: 1>} : vector<8x128xi32>
    %c96_i32 = arith.constant 96 : i32
    %11 = vector.broadcast %c96_i32 : i32 to vector<8x128xi32>
    %12 = arith.cmpi slt, %10, %11 : vector<8x128xi32>
    %cst_13 = arith.constant 0.000000e+00 : f32
    %13 = vector.broadcast %cst_13 : f32 to vector<8x32xf32>
    %cst_14 = arith.constant 0.000000e+00 : f32
    %14 = vector.broadcast %cst_14 : f32 to vector<8x32xf32>
    %c0_i32 = arith.constant 0 : i32
    %15 = arith.index_cast %c0_i32 : i32 to index
    %c0_15 = arith.constant 0 : index
    %c0_16 = arith.constant 0 : index
    %16 = vector.load %arg8[%15, %c0_15, %c0_16] : memref<8x8x128xbf16, #tpu.memory_space<vmem>>, vector<1x8x128xbf16>
    %17 = vector.shape_cast %16 : vector<1x8x128xbf16> to vector<8x128xbf16>
    %18 = arith.extf %17 : vector<8x128xbf16> to vector<8x128xf32>
    %19 = vector.broadcast %8 : vector<1x128xf32> to vector<8x128xf32>
    %20 = arith.addf %18, %19 : vector<8x128xf32>
    %21 = arith.truncf %13 : vector<8x32xf32> to vector<8x32xbf16>
    %cst_17 = arith.constant dense<0.000000e+00> : vector<8x128xf32>
    %22 = tpu.matmul %21, %7, %cst_17 {dimension_numbers = #tpu.dot_dimension_numbers<[1], [0], [0], [1], [0, 0, 1, 1], [], []>} : vector<8x32xbf16>, vector<32x128xbf16>, vector<8x128xf32> -> vector<8x128xf32>
    %23 = arith.addf %20, %22 : vector<8x128xf32>
    %24 = arith.negf %23 : vector<8x128xf32>
    %25 = math.exp %24 : vector<8x128xf32>
    %cst_18 = arith.constant 1.000000e+00 : f32
    %26 = vector.broadcast %cst_18 : f32 to vector<8x128xf32>
    %27 = arith.addf %26, %25 : vector<8x128xf32>
    %28 = arith.divf %26, %27 : vector<8x128xf32>
    %29 = math.tanh %23 : vector<8x128xf32>
    %30 = arith.select %12, %28, %29 : vector<8x128xi1>, vector<8x128xf32>
    %31 = vector.extract_strided_slice %30 {offsets = [0, 0], sizes = [8, 32], strides = [1, 1]} : vector<8x128xf32> to vector<8x32xf32>
    %32 = vector.extract_strided_slice %30 {offsets = [0, 32], sizes = [8, 32], strides = [1, 1]} : vector<8x128xf32> to vector<8x32xf32>
    %33 = vector.extract_strided_slice %30 {offsets = [0, 64], sizes = [8, 32], strides = [1, 1]} : vector<8x128xf32> to vector<8x32xf32>
    %34 = vector.extract_strided_slice %30 {offsets = [0, 96], sizes = [8, 32], strides = [1, 1]} : vector<8x128xf32> to vector<8x32xf32>
    %35 = arith.mulf %32, %14 : vector<8x32xf32>
    %36 = arith.mulf %31, %34 : vector<8x32xf32>
    %37 = arith.addf %35, %36 : vector<8x32xf32>
    %38 = math.tanh %37 : vector<8x32xf32>
    %39 = arith.mulf %33, %38 : vector<8x32xf32>
    %40 = vector.broadcast %c0_i32 : i32 to vector<8x1xi32>
    %41 = arith.cmpi sgt, %9, %40 : vector<8x1xi32>
    %cst_19 = arith.constant 0.000000e+00 : f32
    %42 = vector.shape_cast %41 : vector<8x1xi1> to vector<8x1xi1>
    %43 = vector.broadcast %42 : vector<8x1xi1> to vector<8x32xi1>
    %44 = vector.broadcast %cst_19 : f32 to vector<8x32xf32>
    %45 = arith.select %43, %39, %44 : vector<8x32xi1>, vector<8x32xf32>
    %46 = arith.index_cast %c0_i32 : i32 to index
    %c0_20 = arith.constant 0 : index
    %c0_21 = arith.constant 0 : index
    %47 = vector.load %arg9[%46, %c0_20, %c0_21] : memref<8x8x32xf32, #tpu.memory_space<vmem>>, vector<1x8x32xf32>
    %48 = vector.shape_cast %47 : vector<1x8x32xf32> to vector<8x32xf32>
    %49 = vector.shape_cast %45 : vector<8x32xf32> to vector<1x8x32xf32>
    tpu.vector_store %arg9[%46, %c0_20, %c0_21], %49 {strides = array<i32>} : memref<8x8x32xf32, #tpu.memory_space<vmem>>, vector<1x8x32xf32>,
    %c1_i32 = arith.constant 1 : i32
    %50 = arith.index_cast %c1_i32 : i32 to index
    %c0_22 = arith.constant 0 : index
    %c0_23 = arith.constant 0 : index
    %51 = vector.load %arg8[%50, %c0_22, %c0_23] : memref<8x8x128xbf16, #tpu.memory_space<vmem>>, vector<1x8x128xbf16>
    %52 = vector.shape_cast %51 : vector<1x8x128xbf16> to vector<8x128xbf16>
    %53 = arith.extf %52 : vector<8x128xbf16> to vector<8x128xf32>
    %54 = vector.broadcast %8 : vector<1x128xf32> to vector<8x128xf32>
    %55 = arith.addf %53, %54 : vector<8x128xf32>
    %56 = arith.truncf %39 : vector<8x32xf32> to vector<8x32xbf16>
    %cst_24 = arith.constant dense<0.000000e+00> : vector<8x128xf32>
    %57 = tpu.matmul %56, %7, %cst_24 {dimension_numbers = #tpu.dot_dimension_numbers<[1], [0], [0], [1], [0, 0, 1, 1], [], []>} : vector<8x32xbf16>, vector<32x128xbf16>, vector<8x128xf32> -> vector<8x128xf32>
    %58 = arith.addf %55, %57 : vector<8x128xf32>
    %59 = arith.negf %58 : vector<8x128xf32>
    %60 = math.exp %59 : vector<8x128xf32>
    %cst_25 = arith.constant 1.000000e+00 : f32
    %61 = vector.broadcast %cst_25 : f32 to vector<8x128xf32>
    %62 = arith.addf %61, %60 : vector<8x128xf32>
    %63 = arith.divf %61, %62 : vector<8x128xf32>
    %64 = math.tanh %58 : vector<8x128xf32>
    %65 = arith.select %12, %63, %64 : vector<8x128xi1>, vector<8x128xf32>
    %66 = vector.extract_strided_slice %65 {offsets = [0, 0], sizes = [8, 32], strides = [1, 1]} : vector<8x128xf32> to vector<8x32xf32>
    %67 = vector.extract_strided_slice %65 {offsets = [0, 32], sizes = [8, 32], strides = [1, 1]} : vector<8x128xf32> to vector<8x32xf32>
    %68 = vector.extract_strided_slice %65 {offsets = [0, 64], sizes = [8, 32], strides = [1, 1]} : vector<8x128xf32> to vector<8x32xf32>
    %69 = vector.extract_strided_slice %65 {offsets = [0, 96], sizes = [8, 32], strides = [1, 1]} : vector<8x128xf32> to vector<8x32xf32>
    %70 = arith.mulf %67, %37 : vector<8x32xf32>
    %71 = arith.mulf %66, %69 : vector<8x32xf32>
    %72 = arith.addf %70, %71 : vector<8x32xf32>
    %73 = math.tanh %72 : vector<8x32xf32>
    %74 = arith.mulf %68, %73 : vector<8x32xf32>
    %75 = vector.broadcast %c1_i32 : i32 to vector<8x1xi32>
    %76 = arith.cmpi sgt, %9, %75 : vector<8x1xi32>
    %cst_26 = arith.constant 0.000000e+00 : f32
    %77 = vector.shape_cast %76 : vector<8x1xi1> to vector<8x1xi1>
    %78 = vector.broadcast %77 : vector<8x1xi1> to vector<8x32xi1>
    %79 = vector.broadcast %cst_26 : f32 to vector<8x32xf32>
    %80 = arith.select %78, %74, %79 : vector<8x32xi1>, vector<8x32xf32>
    %81 = arith.index_cast %c1_i32 : i32 to index
    %c0_27 = arith.constant 0 : index
    %c0_28 = arith.constant 0 : index
    %82 = vector.load %arg9[%81, %c0_27, %c0_28] : memref<8x8x32xf32, #tpu.memory_space<vmem>>, vector<1x8x32xf32>
    %83 = vector.shape_cast %82 : vector<1x8x32xf32> to vector<8x32xf32>
    %84 = vector.shape_cast %80 : vector<8x32xf32> to vector<1x8x32xf32>
    tpu.vector_store %arg9[%81, %c0_27, %c0_28], %84 {strides = array<i32>} : memref<8x8x32xf32, #tpu.memory_space<vmem>>, vector<1x8x32xf32>,
    %c2_i32 = arith.constant 2 : i32
    %85 = arith.index_cast %c2_i32 : i32 to index
    %c0_29 = arith.constant 0 : index
    %c0_30 = arith.constant 0 : index
    %86 = vector.load %arg8[%85, %c0_29, %c0_30] : memref<8x8x128xbf16, #tpu.memory_space<vmem>>, vector<1x8x128xbf16>
    %87 = vector.shape_cast %86 : vector<1x8x128xbf16> to vector<8x128xbf16>
    %88 = arith.extf %87 : vector<8x128xbf16> to vector<8x128xf32>
    %89 = vector.broadcast %8 : vector<1x128xf32> to vector<8x128xf32>
    %90 = arith.addf %88, %89 : vector<8x128xf32>
    %91 = arith.truncf %74 : vector<8x32xf32> to vector<8x32xbf16>
    %cst_31 = arith.constant dense<0.000000e+00> : vector<8x128xf32>
    %92 = tpu.matmul %91, %7, %cst_31 {dimension_numbers = #tpu.dot_dimension_numbers<[1], [0], [0], [1], [0, 0, 1, 1], [], []>} : vector<8x32xbf16>, vector<32x128xbf16>, vector<8x128xf32> -> vector<8x128xf32>
    %93 = arith.addf %90, %92 : vector<8x128xf32>
    %94 = arith.negf %93 : vector<8x128xf32>
    %95 = math.exp %94 : vector<8x128xf32>
    %cst_32 = arith.constant 1.000000e+00 : f32
    %96 = vector.broadcast %cst_32 : f32 to vector<8x128xf32>
    %97 = arith.addf %96, %95 : vector<8x128xf32>
    %98 = arith.divf %96, %97 : vector<8x128xf32>
    %99 = math.tanh %93 : vector<8x128xf32>
    %100 = arith.select %12, %98, %99 : vector<8x128xi1>, vector<8x128xf32>
    %101 = vector.extract_strided_slice %100 {offsets = [0, 0], sizes = [8, 32], strides = [1, 1]} : vector<8x128xf32> to vector<8x32xf32>
    %102 = vector.extract_strided_slice %100 {offsets = [0, 32], sizes = [8, 32], strides = [1, 1]} : vector<8x128xf32> to vector<8x32xf32>
    %103 = vector.extract_strided_slice %100 {offsets = [0, 64], sizes = [8, 32], strides = [1, 1]} : vector<8x128xf32> to vector<8x32xf32>
    %104 = vector.extract_strided_slice %100 {offsets = [0, 96], sizes = [8, 32], strides = [1, 1]} : vector<8x128xf32> to vector<8x32xf32>
    %105 = arith.mulf %102, %72 : vector<8x32xf32>
    %106 = arith.mulf %101, %104 : vector<8x32xf32>
    %107 = arith.addf %105, %106 : vector<8x32xf32>
    %108 = math.tanh %107 : vector<8x32xf32>
    %109 = arith.mulf %103, %108 : vector<8x32xf32>
    %110 = vector.broadcast %c2_i32 : i32 to vector<8x1xi32>
    %111 = arith.cmpi sgt, %9, %110 : vector<8x1xi32>
    %cst_33 = arith.constant 0.000000e+00 : f32
    %112 = vector.shape_cast %111 : vector<8x1xi1> to vector<8x1xi1>
    %113 = vector.broadcast %112 : vector<8x1xi1> to vector<8x32xi1>
    %114 = vector.broadcast %cst_33 : f32 to vector<8x32xf32>
    %115 = arith.select %113, %109, %114 : vector<8x32xi1>, vector<8x32xf32>
    %116 = arith.index_cast %c2_i32 : i32 to index
    %c0_34 = arith.constant 0 : index
    %c0_35 = arith.constant 0 : index
    %117 = vector.load %arg9[%116, %c0_34, %c0_35] : memref<8x8x32xf32, #tpu.memory_space<vmem>>, vector<1x8x32xf32>
    %118 = vector.shape_cast %117 : vector<1x8x32xf32> to vector<8x32xf32>
    %119 = vector.shape_cast %115 : vector<8x32xf32> to vector<1x8x32xf32>
    tpu.vector_store %arg9[%116, %c0_34, %c0_35], %119 {strides = array<i32>} : memref<8x8x32xf32, #tpu.memory_space<vmem>>, vector<1x8x32xf32>,
    %c3_i32 = arith.constant 3 : i32
    %120 = arith.index_cast %c3_i32 : i32 to index
    %c0_36 = arith.constant 0 : index
    %c0_37 = arith.constant 0 : index
    %121 = vector.load %arg8[%120, %c0_36, %c0_37] : memref<8x8x128xbf16, #tpu.memory_space<vmem>>, vector<1x8x128xbf16>
    %122 = vector.shape_cast %121 : vector<1x8x128xbf16> to vector<8x128xbf16>
    %123 = arith.extf %122 : vector<8x128xbf16> to vector<8x128xf32>
    %124 = vector.broadcast %8 : vector<1x128xf32> to vector<8x128xf32>
    %125 = arith.addf %123, %124 : vector<8x128xf32>
    %126 = arith.truncf %109 : vector<8x32xf32> to vector<8x32xbf16>
    %cst_38 = arith.constant dense<0.000000e+00> : vector<8x128xf32>
    %127 = tpu.matmul %126, %7, %cst_38 {dimension_numbers = #tpu.dot_dimension_numbers<[1], [0], [0], [1], [0, 0, 1, 1], [], []>} : vector<8x32xbf16>, vector<32x128xbf16>, vector<8x128xf32> -> vector<8x128xf32>
    %128 = arith.addf %125, %127 : vector<8x128xf32>
    %129 = arith.negf %128 : vector<8x128xf32>
    %130 = math.exp %129 : vector<8x128xf32>
    %cst_39 = arith.constant 1.000000e+00 : f32
    %131 = vector.broadcast %cst_39 : f32 to vector<8x128xf32>
    %132 = arith.addf %131, %130 : vector<8x128xf32>
    %133 = arith.divf %131, %132 : vector<8x128xf32>
    %134 = math.tanh %128 : vector<8x128xf32>
    %135 = arith.select %12, %133, %134 : vector<8x128xi1>, vector<8x128xf32>
    %136 = vector.extract_strided_slice %135 {offsets = [0, 0], sizes = [8, 32], strides = [1, 1]} : vector<8x128xf32> to vector<8x32xf32>
    %137 = vector.extract_strided_slice %135 {offsets = [0, 32], sizes = [8, 32], strides = [1, 1]} : vector<8x128xf32> to vector<8x32xf32>
    %138 = vector.extract_strided_slice %135 {offsets = [0, 64], sizes = [8, 32], strides = [1, 1]} : vector<8x128xf32> to vector<8x32xf32>
    %139 = vector.extract_strided_slice %135 {offsets = [0, 96], sizes = [8, 32], strides = [1, 1]} : vector<8x128xf32> to vector<8x32xf32>
    %140 = arith.mulf %137, %107 : vector<8x32xf32>
    %141 = arith.mulf %136, %139 : vector<8x32xf32>
    %142 = arith.addf %140, %141 : vector<8x32xf32>
    %143 = math.tanh %142 : vector<8x32xf32>
    %144 = arith.mulf %138, %143 : vector<8x32xf32>
    %145 = vector.broadcast %c3_i32 : i32 to vector<8x1xi32>
    %146 = arith.cmpi sgt, %9, %145 : vector<8x1xi32>
    %cst_40 = arith.constant 0.000000e+00 : f32
    %147 = vector.shape_cast %146 : vector<8x1xi1> to vector<8x1xi1>
    %148 = vector.broadcast %147 : vector<8x1xi1> to vector<8x32xi1>
    %149 = vector.broadcast %cst_40 : f32 to vector<8x32xf32>
    %150 = arith.select %148, %144, %149 : vector<8x32xi1>, vector<8x32xf32>
    %151 = arith.index_cast %c3_i32 : i32 to index
    %c0_41 = arith.constant 0 : index
    %c0_42 = arith.constant 0 : index
    %152 = vector.load %arg9[%151, %c0_41, %c0_42] : memref<8x8x32xf32, #tpu.memory_space<vmem>>, vector<1x8x32xf32>
    %153 = vector.shape_cast %152 : vector<1x8x32xf32> to vector<8x32xf32>
    %154 = vector.shape_cast %150 : vector<8x32xf32> to vector<1x8x32xf32>
    tpu.vector_store %arg9[%151, %c0_41, %c0_42], %154 {strides = array<i32>} : memref<8x8x32xf32, #tpu.memory_space<vmem>>, vector<1x8x32xf32>,
    %c4_i32 = arith.constant 4 : i32
    %155 = arith.index_cast %c4_i32 : i32 to index
    %c0_43 = arith.constant 0 : index
    %c0_44 = arith.constant 0 : index
    %156 = vector.load %arg8[%155, %c0_43, %c0_44] : memref<8x8x128xbf16, #tpu.memory_space<vmem>>, vector<1x8x128xbf16>
    %157 = vector.shape_cast %156 : vector<1x8x128xbf16> to vector<8x128xbf16>
    %158 = arith.extf %157 : vector<8x128xbf16> to vector<8x128xf32>
    %159 = vector.broadcast %8 : vector<1x128xf32> to vector<8x128xf32>
    %160 = arith.addf %158, %159 : vector<8x128xf32>
    %161 = arith.truncf %144 : vector<8x32xf32> to vector<8x32xbf16>
    %cst_45 = arith.constant dense<0.000000e+00> : vector<8x128xf32>
    %162 = tpu.matmul %161, %7, %cst_45 {dimension_numbers = #tpu.dot_dimension_numbers<[1], [0], [0], [1], [0, 0, 1, 1], [], []>} : vector<8x32xbf16>, vector<32x128xbf16>, vector<8x128xf32> -> vector<8x128xf32>
    %163 = arith.addf %160, %162 : vector<8x128xf32>
    %164 = arith.negf %163 : vector<8x128xf32>
    %165 = math.exp %164 : vector<8x128xf32>
    %cst_46 = arith.constant 1.000000e+00 : f32
    %166 = vector.broadcast %cst_46 : f32 to vector<8x128xf32>
    %167 = arith.addf %166, %165 : vector<8x128xf32>
    %168 = arith.divf %166, %167 : vector<8x128xf32>
    %169 = math.tanh %163 : vector<8x128xf32>
    %170 = arith.select %12, %168, %169 : vector<8x128xi1>, vector<8x128xf32>
    %171 = vector.extract_strided_slice %170 {offsets = [0, 0], sizes = [8, 32], strides = [1, 1]} : vector<8x128xf32> to vector<8x32xf32>
    %172 = vector.extract_strided_slice %170 {offsets = [0, 32], sizes = [8, 32], strides = [1, 1]} : vector<8x128xf32> to vector<8x32xf32>
    %173 = vector.extract_strided_slice %170 {offsets = [0, 64], sizes = [8, 32], strides = [1, 1]} : vector<8x128xf32> to vector<8x32xf32>
    %174 = vector.extract_strided_slice %170 {offsets = [0, 96], sizes = [8, 32], strides = [1, 1]} : vector<8x128xf32> to vector<8x32xf32>
    %175 = arith.mulf %172, %142 : vector<8x32xf32>
    %176 = arith.mulf %171, %174 : vector<8x32xf32>
    %177 = arith.addf %175, %176 : vector<8x32xf32>
    %178 = math.tanh %177 : vector<8x32xf32>
    %179 = arith.mulf %173, %178 : vector<8x32xf32>
    %180 = vector.broadcast %c4_i32 : i32 to vector<8x1xi32>
    %181 = arith.cmpi sgt, %9, %180 : vector<8x1xi32>
    %cst_47 = arith.constant 0.000000e+00 : f32
    %182 = vector.shape_cast %181 : vector<8x1xi1> to vector<8x1xi1>
    %183 = vector.broadcast %182 : vector<8x1xi1> to vector<8x32xi1>
    %184 = vector.broadcast %cst_47 : f32 to vector<8x32xf32>
    %185 = arith.select %183, %179, %184 : vector<8x32xi1>, vector<8x32xf32>
    %186 = arith.index_cast %c4_i32 : i32 to index
    %c0_48 = arith.constant 0 : index
    %c0_49 = arith.constant 0 : index
    %187 = vector.load %arg9[%186, %c0_48, %c0_49] : memref<8x8x32xf32, #tpu.memory_space<vmem>>, vector<1x8x32xf32>
    %188 = vector.shape_cast %187 : vector<1x8x32xf32> to vector<8x32xf32>
    %189 = vector.shape_cast %185 : vector<8x32xf32> to vector<1x8x32xf32>
    tpu.vector_store %arg9[%186, %c0_48, %c0_49], %189 {strides = array<i32>} : memref<8x8x32xf32, #tpu.memory_space<vmem>>, vector<1x8x32xf32>,
    %c5_i32 = arith.constant 5 : i32
    %190 = arith.index_cast %c5_i32 : i32 to index
    %c0_50 = arith.constant 0 : index
    %c0_51 = arith.constant 0 : index
    %191 = vector.load %arg8[%190, %c0_50, %c0_51] : memref<8x8x128xbf16, #tpu.memory_space<vmem>>, vector<1x8x128xbf16>
    %192 = vector.shape_cast %191 : vector<1x8x128xbf16> to vector<8x128xbf16>
    %193 = arith.extf %192 : vector<8x128xbf16> to vector<8x128xf32>
    %194 = vector.broadcast %8 : vector<1x128xf32> to vector<8x128xf32>
    %195 = arith.addf %193, %194 : vector<8x128xf32>
    %196 = arith.truncf %179 : vector<8x32xf32> to vector<8x32xbf16>
    %cst_52 = arith.constant dense<0.000000e+00> : vector<8x128xf32>
    %197 = tpu.matmul %196, %7, %cst_52 {dimension_numbers = #tpu.dot_dimension_numbers<[1], [0], [0], [1], [0, 0, 1, 1], [], []>} : vector<8x32xbf16>, vector<32x128xbf16>, vector<8x128xf32> -> vector<8x128xf32>
    %198 = arith.addf %195, %197 : vector<8x128xf32>
    %199 = arith.negf %198 : vector<8x128xf32>
    %200 = math.exp %199 : vector<8x128xf32>
    %cst_53 = arith.constant 1.000000e+00 : f32
    %201 = vector.broadcast %cst_53 : f32 to vector<8x128xf32>
    %202 = arith.addf %201, %200 : vector<8x128xf32>
    %203 = arith.divf %201, %202 : vector<8x128xf32>
    %204 = math.tanh %198 : vector<8x128xf32>
    %205 = arith.select %12, %203, %204 : vector<8x128xi1>, vector<8x128xf32>
    %206 = vector.extract_strided_slice %205 {offsets = [0, 0], sizes = [8, 32], strides = [1, 1]} : vector<8x128xf32> to vector<8x32xf32>
    %207 = vector.extract_strided_slice %205 {offsets = [0, 32], sizes = [8, 32], strides = [1, 1]} : vector<8x128xf32> to vector<8x32xf32>
    %208 = vector.extract_strided_slice %205 {offsets = [0, 64], sizes = [8, 32], strides = [1, 1]} : vector<8x128xf32> to vector<8x32xf32>
    %209 = vector.extract_strided_slice %205 {offsets = [0, 96], sizes = [8, 32], strides = [1, 1]} : vector<8x128xf32> to vector<8x32xf32>
    %210 = arith.mulf %207, %177 : vector<8x32xf32>
    %211 = arith.mulf %206, %209 : vector<8x32xf32>
    %212 = arith.addf %210, %211 : vector<8x32xf32>
    %213 = math.tanh %212 : vector<8x32xf32>
    %214 = arith.mulf %208, %213 : vector<8x32xf32>
    %215 = vector.broadcast %c5_i32 : i32 to vector<8x1xi32>
    %216 = arith.cmpi sgt, %9, %215 : vector<8x1xi32>
    %cst_54 = arith.constant 0.000000e+00 : f32
    %217 = vector.shape_cast %216 : vector<8x1xi1> to vector<8x1xi1>
    %218 = vector.broadcast %217 : vector<8x1xi1> to vector<8x32xi1>
    %219 = vector.broadcast %cst_54 : f32 to vector<8x32xf32>
    %220 = arith.select %218, %214, %219 : vector<8x32xi1>, vector<8x32xf32>
    %221 = arith.index_cast %c5_i32 : i32 to index
    %c0_55 = arith.constant 0 : index
    %c0_56 = arith.constant 0 : index
    %222 = vector.load %arg9[%221, %c0_55, %c0_56] : memref<8x8x32xf32, #tpu.memory_space<vmem>>, vector<1x8x32xf32>
    %223 = vector.shape_cast %222 : vector<1x8x32xf32> to vector<8x32xf32>
    %224 = vector.shape_cast %220 : vector<8x32xf32> to vector<1x8x32xf32>
    tpu.vector_store %arg9[%221, %c0_55, %c0_56], %224 {strides = array<i32>} : memref<8x8x32xf32, #tpu.memory_space<vmem>>, vector<1x8x32xf32>,
    %c6_i32 = arith.constant 6 : i32
    %225 = arith.index_cast %c6_i32 : i32 to index
    %c0_57 = arith.constant 0 : index
    %c0_58 = arith.constant 0 : index
    %226 = vector.load %arg8[%225, %c0_57, %c0_58] : memref<8x8x128xbf16, #tpu.memory_space<vmem>>, vector<1x8x128xbf16>
    %227 = vector.shape_cast %226 : vector<1x8x128xbf16> to vector<8x128xbf16>
    %228 = arith.extf %227 : vector<8x128xbf16> to vector<8x128xf32>
    %229 = vector.broadcast %8 : vector<1x128xf32> to vector<8x128xf32>
    %230 = arith.addf %228, %229 : vector<8x128xf32>
    %231 = arith.truncf %214 : vector<8x32xf32> to vector<8x32xbf16>
    %cst_59 = arith.constant dense<0.000000e+00> : vector<8x128xf32>
    %232 = tpu.matmul %231, %7, %cst_59 {dimension_numbers = #tpu.dot_dimension_numbers<[1], [0], [0], [1], [0, 0, 1, 1], [], []>} : vector<8x32xbf16>, vector<32x128xbf16>, vector<8x128xf32> -> vector<8x128xf32>
    %233 = arith.addf %230, %232 : vector<8x128xf32>
    %234 = arith.negf %233 : vector<8x128xf32>
    %235 = math.exp %234 : vector<8x128xf32>
    %cst_60 = arith.constant 1.000000e+00 : f32
    %236 = vector.broadcast %cst_60 : f32 to vector<8x128xf32>
    %237 = arith.addf %236, %235 : vector<8x128xf32>
    %238 = arith.divf %236, %237 : vector<8x128xf32>
    %239 = math.tanh %233 : vector<8x128xf32>
    %240 = arith.select %12, %238, %239 : vector<8x128xi1>, vector<8x128xf32>
    %241 = vector.extract_strided_slice %240 {offsets = [0, 0], sizes = [8, 32], strides = [1, 1]} : vector<8x128xf32> to vector<8x32xf32>
    %242 = vector.extract_strided_slice %240 {offsets = [0, 32], sizes = [8, 32], strides = [1, 1]} : vector<8x128xf32> to vector<8x32xf32>
    %243 = vector.extract_strided_slice %240 {offsets = [0, 64], sizes = [8, 32], strides = [1, 1]} : vector<8x128xf32> to vector<8x32xf32>
    %244 = vector.extract_strided_slice %240 {offsets = [0, 96], sizes = [8, 32], strides = [1, 1]} : vector<8x128xf32> to vector<8x32xf32>
    %245 = arith.mulf %242, %212 : vector<8x32xf32>
    %246 = arith.mulf %241, %244 : vector<8x32xf32>
    %247 = arith.addf %245, %246 : vector<8x32xf32>
    %248 = math.tanh %247 : vector<8x32xf32>
    %249 = arith.mulf %243, %248 : vector<8x32xf32>
    %250 = vector.broadcast %c6_i32 : i32 to vector<8x1xi32>
    %251 = arith.cmpi sgt, %9, %250 : vector<8x1xi32>
    %cst_61 = arith.constant 0.000000e+00 : f32
    %252 = vector.shape_cast %251 : vector<8x1xi1> to vector<8x1xi1>
    %253 = vector.broadcast %252 : vector<8x1xi1> to vector<8x32xi1>
    %254 = vector.broadcast %cst_61 : f32 to vector<8x32xf32>
    %255 = arith.select %253, %249, %254 : vector<8x32xi1>, vector<8x32xf32>
    %256 = arith.index_cast %c6_i32 : i32 to index
    %c0_62 = arith.constant 0 : index
    %c0_63 = arith.constant 0 : index
    %257 = vector.load %arg9[%256, %c0_62, %c0_63] : memref<8x8x32xf32, #tpu.memory_space<vmem>>, vector<1x8x32xf32>
    %258 = vector.shape_cast %257 : vector<1x8x32xf32> to vector<8x32xf32>
    %259 = vector.shape_cast %255 : vector<8x32xf32> to vector<1x8x32xf32>
    tpu.vector_store %arg9[%256, %c0_62, %c0_63], %259 {strides = array<i32>} : memref<8x8x32xf32, #tpu.memory_space<vmem>>, vector<1x8x32xf32>,
    %c7_i32 = arith.constant 7 : i32
    %260 = arith.index_cast %c7_i32 : i32 to index
    %c0_64 = arith.constant 0 : index
    %c0_65 = arith.constant 0 : index
    %261 = vector.load %arg8[%260, %c0_64, %c0_65] : memref<8x8x128xbf16, #tpu.memory_space<vmem>>, vector<1x8x128xbf16>
    %262 = vector.shape_cast %261 : vector<1x8x128xbf16> to vector<8x128xbf16>
    %263 = arith.extf %262 : vector<8x128xbf16> to vector<8x128xf32>
    %264 = vector.broadcast %8 : vector<1x128xf32> to vector<8x128xf32>
    %265 = arith.addf %263, %264 : vector<8x128xf32>
    %266 = arith.truncf %249 : vector<8x32xf32> to vector<8x32xbf16>
    %cst_66 = arith.constant dense<0.000000e+00> : vector<8x128xf32>
    %267 = tpu.matmul %266, %7, %cst_66 {dimension_numbers = #tpu.dot_dimension_numbers<[1], [0], [0], [1], [0, 0, 1, 1], [], []>} : vector<8x32xbf16>, vector<32x128xbf16>, vector<8x128xf32> -> vector<8x128xf32>
    %268 = arith.addf %265, %267 : vector<8x128xf32>
    %269 = arith.negf %268 : vector<8x128xf32>
    %270 = math.exp %269 : vector<8x128xf32>
    %cst_67 = arith.constant 1.000000e+00 : f32
    %271 = vector.broadcast %cst_67 : f32 to vector<8x128xf32>
    %272 = arith.addf %271, %270 : vector<8x128xf32>
    %273 = arith.divf %271, %272 : vector<8x128xf32>
    %274 = math.tanh %268 : vector<8x128xf32>
    %275 = arith.select %12, %273, %274 : vector<8x128xi1>, vector<8x128xf32>
    %276 = vector.extract_strided_slice %275 {offsets = [0, 0], sizes = [8, 32], strides = [1, 1]} : vector<8x128xf32> to vector<8x32xf32>
    %277 = vector.extract_strided_slice %275 {offsets = [0, 32], sizes = [8, 32], strides = [1, 1]} : vector<8x128xf32> to vector<8x32xf32>
    %278 = vector.extract_strided_slice %275 {offsets = [0, 64], sizes = [8, 32], strides = [1, 1]} : vector<8x128xf32> to vector<8x32xf32>
    %279 = vector.extract_strided_slice %275 {offsets = [0, 96], sizes = [8, 32], strides = [1, 1]} : vector<8x128xf32> to vector<8x32xf32>
    %280 = arith.mulf %277, %247 : vector<8x32xf32>
    %281 = arith.mulf %276, %279 : vector<8x32xf32>
    %282 = arith.addf %280, %281 : vector<8x32xf32>
    %283 = math.tanh %282 : vector<8x32xf32>
    %284 = arith.mulf %278, %283 : vector<8x32xf32>
    %285 = vector.broadcast %c7_i32 : i32 to vector<8x1xi32>
    %286 = arith.cmpi sgt, %9, %285 : vector<8x1xi32>
    %cst_68 = arith.constant 0.000000e+00 : f32
    %287 = vector.shape_cast %286 : vector<8x1xi1> to vector<8x1xi1>
    %288 = vector.broadcast %287 : vector<8x1xi1> to vector<8x32xi1>
    %289 = vector.broadcast %cst_68 : f32 to vector<8x32xf32>
    %290 = arith.select %288, %284, %289 : vector<8x32xi1>, vector<8x32xf32>
    %291 = arith.index_cast %c7_i32 : i32 to index
    %c0_69 = arith.constant 0 : index
    %c0_70 = arith.constant 0 : index
    %292 = vector.load %arg9[%291, %c0_69, %c0_70] : memref<8x8x32xf32, #tpu.memory_space<vmem>>, vector<1x8x32xf32>
    %293 = vector.shape_cast %292 : vector<1x8x32xf32> to vector<8x32xf32>
    %294 = vector.shape_cast %290 : vector<8x32xf32> to vector<1x8x32xf32>
    tpu.vector_store %arg9[%291, %c0_69, %c0_70], %294 {strides = array<i32>} : memref<8x8x32xf32, #tpu.memory_space<vmem>>, vector<1x8x32xf32>,
    %c8_i32 = arith.constant 8 : i32
    %c0_71 = arith.constant 0 : index
    %c0_72 = arith.constant 0 : index
    %c0_73 = arith.constant 0 : index
    %295 = vector.load %arg9[%c0_71, %c0_72, %c0_73] : memref<8x8x32xf32, #tpu.memory_space<vmem>>, vector<8x8x32xf32>
    %296 = vector.shape_cast %295 : vector<8x8x32xf32> to vector<64x32xf32>
    %297 = arith.truncf %296 : vector<64x32xf32> to vector<64x32xbf16>
    %c0_74 = arith.constant 0 : index
    %c0_75 = arith.constant 0 : index
    %298 = vector.load %arg5[%c0_74, %c0_75] : memref<32x128xbf16, #tpu.memory_space<vmem>>, vector<32x128xbf16>
    %cst_76 = arith.constant dense<0.000000e+00> : vector<64x128xf32>
    %299 = tpu.matmul %297, %298, %cst_76 {dimension_numbers = #tpu.dot_dimension_numbers<[1], [0], [0], [1], [0, 0, 1, 1], [], []>} : vector<64x32xbf16>, vector<32x128xbf16>, vector<64x128xf32> -> vector<64x128xf32>
    %c0_77 = arith.constant 0 : index
    %c0_78 = arith.constant 0 : index
    %300 = vector.load %arg6[%c0_77, %c0_78] : memref<1x128xf32, #tpu.memory_space<vmem>>, vector<1x128xf32>
    %301 = vector.broadcast %300 : vector<1x128xf32> to vector<64x128xf32>
    %302 = arith.addf %299, %301 : vector<64x128xf32>
    %303 = vector.shape_cast %302 : vector<64x128xf32> to vector<8x8x128xf32>
    %c0_79 = arith.constant 0 : index
    %c0_80 = arith.constant 0 : index
    %c0_81 = arith.constant 0 : index
    %304 = vector.load %arg7[%c0_79, %c0_80, %c0_81] : memref<8x8x128xf32, #tpu.memory_space<vmem>>, vector<8x8x128xf32>
    tpu.vector_store %arg7[%c0_79, %c0_80, %c0_81], %303 {strides = array<i32>} : memref<8x8x128xf32, #tpu.memory_space<vmem>>, vector<8x8x128xf32>,
    return
  }
}

</mosaic_0001>

<bundles_post_ra>
// kernel: tpu_custom_call.1
= control target key start
LH: loop header
LB: loop body
LE: loop exit
PB: predicated region body
PF: predicated region fallthrough
CT: control target
= control target key end

     0   :  { %12 = vsyncpa [#allocation5], 0  ;;  %s1427_s0 = inlined_call_operand.hbm [shape: bf16[8,8,16], index: 0, kind: input, shape index: {}]   ;;  %s1428_s1 = inlined_call_operand.vmem [shape: s32[8,1], index: 1, kind: input, shape index: {}]   ;;  %s1429_s2 = inlined_call_operand.vmem [shape: bf16[16,128], index: 2, kind: input, shape index: {}]   ;;  %s1430_s3 = inlined_call_operand.hbm [shape: bf16[32,128], index: 3, kind: input, shape index: {}]   ;;  %s1431_s4 = inlined_call_operand.vmem [shape: f32[1,128], index: 4, kind: input, shape index: {}]   ;;  %s1432_s5 = inlined_call_operand.hbm [shape: bf16[32,128], index: 5, kind: input, shape index: {}]   ;;  %s1433_s6 = inlined_call_operand.vmem [shape: f32[1,128], index: 6, kind: input, shape index: {}]   ;;  %s1434_s7 = inlined_call_operand.hbm [shape: f32[8,8,128], index: 7, kind: output, shape index: {}]  }
   0x1   :  { %13 = vsyncpa [#allocation8], 0 }
   0x2   :  { %14 = vsyncpa [#allocation6], 0  ;;  %s36_s26 = sshll.u32 %s1430_s3, 4  ;;  %s1169_s27 = smov [#allocation7]   ;;  %s37_s26 = int_to_ptr.hbm [resolvable:$true] %s36_s26 }
   0x3   :  { %s38_s28 = sshll.u32 %s1169_s27, 4  ;;  %s19_s8 = sshll.u32 %s1427_s0, 4  ;;  %s39_s28 = int_to_ptr.vmem [resolvable:$true] %s38_s28  ;;  %s20_s8 = int_to_ptr.hbm [resolvable:$true] %s19_s8 }
   0x4   :  { %s1170_s9 = smov 64   ;;  %s1171_s10 = smov 4  }
   0x5   :  { %44 = dma.hbm_to_vmem [thread:$0]  %s37_s26, 256, %s39_s28, [#allocation8], %s1170_s9, %s1170_s9, %s1171_s10  }
   0x6   :  { %s1172_s11 = smov [#allocation4]   ;;  %s51_s3 = sshll.u32 %s1432_s5, 4  ;;  %s52_s3 = int_to_ptr.hbm [resolvable:$true] %s51_s3 }
   0x7   :  { %s21_s12 = sshll.u32 %s1172_s11, 4  ;;  %s1173_s15 = smov [#allocation9]   ;;  %s22_s12 = int_to_ptr.vmem [resolvable:$true] %s21_s12 }
   0x8   :  { %27 = dma.hbm_to_vmem [thread:$0]  %s20_s8, 512, %s22_s12, [#allocation5], %s1170_s9, %s1170_s9, %s1171_s10  }
   0x9   :  { %s53_s16 = sshll.u32 %s1173_s15, 4  ;;  %s54_s16 = int_to_ptr.vmem [resolvable:$true] %s53_s16 }
   0xa   :  { %59 = dma.hbm_to_vmem [thread:$0]  %s52_s3, 256, %s54_s16, [#allocation8], %s1170_s9, %s1170_s9, %s1171_s10  }
   0xb   :  { %1163 = dma.done.wait [#allocation5], 512  }
   0xc   :  { %1164 = vsyncadd [#allocation5], 4294966784 }
   0xd   :  { %1165 = dma.done.wait [#allocation8], 512  }
   0xe   :  { %1166 = vsyncadd [#allocation8], 4294966784  ;;  %v1174_v0 = vmov 0   ;;  %v960_v1 = vld [vmem:[%s1429_s2] sm:$0xff]  ;;  %v1240_v2 = vld [vmem:[#allocation7 + $0x8] sm:$0xff]  ;;  %vm111_vm0 = vcmask 130048   ;;  %v175_v19 = vlaneseq }
   0xf   :  { %998 = vset.pattern.permute.xlu0 %v1174_v0  ;;  %999 = vset.pattern.permute.xlu1 %v1174_v0  ;;  %v956_v3 = vld [vmem:[#allocation4] sm:$0xff]  ;;  %vm196_vm6 = vcmask 261120   ;;  %s883_s24 = sshll.u32 %s1434_s7, 4  ;;  %s1177_s25 = smov 128   ;;  %s884_s24 = int_to_ptr.hbm [resolvable:$true] %s883_s24 }
  0x10   :  { %1000 = vset.pattern.permute.xlu2 %v1174_v0  ;;  %131 = vmatpush.bf16.msra.mxu0 %v960_v1  ;;  %v1243_v4 = vld [vmem:[#allocation7] sm:$0xff]  ;;  %v1262_v22 = vand.u32 127, %v175_v19  ;;  %s1178_s26 = smov 8  }
  0x11   :  { %206 = vmatpush.bf16.msra.mxu1 %v1240_v2  ;;  %281 = vmatpush.bf16.msra.mxu2 %v1240_v2  ;;  %v1259_v10 = vld [vmem:[%s1431_s4] ss:$0 sm:$0xff]  ;;  %s1175_s4 = smov 32  }
  0x12   :  { %vm177_vm3 = vcmp.lt.s32.totalorder %v1262_v22, 96 }
  0x13   :  { %917 = vmatmul.msk.bf16.vlgmr.msra.gmra.mxu0 %vm111_vm0, %v956_v3 }
  0x15   :  { %207 = vmatpush.bf16.msra.mxu1 %v1243_v4  ;;  %282 = vmatpush.bf16.msra.mxu2 %v1243_v4 }
  0x18   :  { %208 = vmatmul.bf16.vlgmr.msra.gmra.mxu1 %v1174_v0 }
  0x19   :  { %357 = vmatpush.bf16.msrb.mxu1 %v1240_v2  ;;  %509 = vmatpush.bf16.msrb.mxu2 %v1240_v2 }
  0x1d   :  { %358 = vmatpush.bf16.msrb.mxu1 %v1243_v4  ;;  %510 = vmatpush.bf16.msrb.mxu2 %v1243_v4 }
  0x21   :  { %433 = vmatpush.bf16.msra.mxu1 %v1240_v2 }
  0x25   :  { %434 = vmatpush.bf16.msra.mxu1 %v1243_v4 }
  0x90   :  { %v133_v5 = vpop.f32.mrf.mxu0 }
  0x95   :  { %v209_v6 = vpop.f32.mrf.mxu1 }
  0x98   :  { %v135_v7 = vpop.f32.mrf.mxu0 }
  0x99   :  { %v968_v8 = vpack.c.bf16 %v135_v7, %v133_v5  ;;  %v957_v7 = vld [vmem:[#allocation4 + $0x8] sm:$0xff] }
  0x9a   :  { %918 = vmatmul.msk.bf16.gmra.mxu0 %vm111_vm0, %v957_v7 }
  0x9b   :  { %969 = vst [vmem:[#allocation2] sm:$0xff] %v968_v8  }
  0x9d   :  { %v211_v9 = vpop.f32.mrf.mxu1 }
  0xa2   :  { %v178_v11 = vld [vmem:[#allocation2] sm:$0xff]  }
  0xa3   :  { %v179_v12 = vunpack.c.l.bf16 %v178_v11  ;;  %v266_v42 = vunpack.c.h.bf16 %v178_v11 }
  0xa5   :  { %v183_v13 = vadd.f32 %v1259_v10, %v179_v12  ;;  %v267_v43 = vadd.f32 %v1259_v10, %v266_v42 }
  0xa7   :  { %v213_v14 = vadd.f32 %v209_v6, %v183_v13 }
  0xa9   :  { %v929_v15 = vmul.f32 -1.442695, %v213_v14 }
  0xab   :  { %1003 = vpow2.f32 %v929_v15 }
  0xb1   :  { %v1004_v16 = vpop.eup %1003 }
  0xb2   :  { %v217_v17 = vadd.f32 1.0, %v1004_v16 }
  0xb4   :  { %1005 = vrcp.f32 %v217_v17  ;;  %v229_v23 = vand.u32 2147483648, %v217_v17  ;;  %v227_v25 = vand.u32 2147483647, %v217_v17  ;;  %vm223_vm2 = vweird.f32 %v217_v17 }
  0xb5   :  { %1007 = vtanh.f32 %v213_v14 }
  0xb6   :  { %v230_v27 = vor.u32 1.1754944e-38, %v229_v23  ;;  %vm228_vm5 = vcmp.eq.f32.partialorder %v227_v25, 8.507059e+37 }
  0xba   :  { %v1006_v18 = vpop.eup %1005 }
  0xbb   :  { %v219_v20 = vmul.f32 %v1006_v18, %v217_v17  ;;  %vm224_vm1 = vweird.f32 %v1006_v18  ;;  %v1008_v29 = vpop.eup %1007 }
  0xbc   :  { %vm225_vm4 = vmor %vm223_vm2, %vm224_vm1 }
  0xbd   :  { %v220_v21 = vsub.f32 1.0, %v219_v20 }
  0xbf   :  { %v221_v24 = vmul.f32 %v1006_v18, %v220_v21 }
  0xc1   :  { %v222_v26 = vadd.f32 %v1006_v18, %v221_v24 }
  0xc3   :  { %v226_v28 = vsel %vm225_vm4, %v1006_v18, %v222_v26 }
  0xc4   :  { %v231_v30 = vsel %vm228_vm5, %v230_v27, %v226_v28 }
  0xc5   :  { %v234_v31 = vsel %vm177_vm3, %v231_v30, %v1008_v29 }
  0xc6   :  { %237 = vrot.lane.b32.xlu0 %v234_v31, %s1175_s4  ;;  %v235_v34 = vmul.f32 0.0, %v234_v31 }
 0x117   :  { %v138_v12 = vpop.f32.mrf.mxu0 }
 0x11f   :  { %v140_v13 = vpop.f32.mrf.mxu0 }
 0x120   :  { %v973_v14 = vpack.c.bf16 %v140_v13, %v138_v12 }
 0x122   :  { %985 = vst [vmem:[#allocation2 + $0x8] sm:$0xff] %v973_v14  }
 0x129   :  { %v341_v16 = vld [vmem:[#allocation2 + $0x8] sm:$0xff]  }
 0x12a   :  { %v342_v17 = vunpack.c.l.bf16 %v341_v16 }
 0x12c   :  { %v343_v18 = vadd.f32 %v1259_v10, %v342_v17 }
 0x138   :  { %v238_v32 = vpop.permute.xlu0 %237 }
 0x139   :  { %v240_v33 = vmul.f32 %v238_v32, %v234_v31 }
 0x13b   :  { %242 = vrot.lane.b32.xlu0 %v240_v33, %s1175_s4 }
 0x1ad   :  { %v243_v35 = vpop.permute.xlu0 %242 }
 0x1ae   :  { %v245_v36 = vadd.f32 %v243_v35, %v235_v34 }
 0x1b0   :  { %1009 = vtanh.f32 %v245_v36 }
 0x1b6   :  { %v1010_v37 = vpop.eup %1009 }
 0x1b7   :  { %248 = vrot.lane.b32.xlu1 %v1010_v37, %s1175_s4 }
 0x229   :  { %v249_v38 = vpop.permute.xlu1 %248 }
 0x22a   :  { %v1270_v39 = vmul.f32 %v249_v38, %v234_v31 }
 0x22c   :  { %v268_v40 = vpack.c.bf16 %v1270_v39, %v1270_v39 }
 0x22e   :  { %270 = vrot.lane.b32.xlu1 %v268_v40, %s1170_s9 }
 0x2a0   :  { %v271_v41 = vpop.permute.xlu1 %270 }
 0x2a1   :  { %930 = vmatmul.msk.bf16.vlgmr.msra.gmra.mxu2 %vm196_vm6, %v271_v41 }
 0x2a2   :  { %585 = vmatpush.bf16.msra.mxu2 %v1240_v2 }
 0x2a6   :  { %586 = vmatpush.bf16.msra.mxu2 %v1243_v4 }
 0x324   :  { %v284_v44 = vpop.f32.mrf.mxu2 }
 0x325   :  { %v288_v45 = vadd.f32 %v284_v44, %v267_v43 }
 0x327   :  { %v931_v46 = vmul.f32 -1.442695, %v288_v45 }
 0x329   :  { %1011 = vpow2.f32 %v931_v46 }
 0x32c   :  { %v286_v47 = vpop.f32.mrf.mxu2 }
 0x32f   :  { %v1012_v48 = vpop.eup %1011 }
 0x330   :  { %v292_v49 = vadd.f32 1.0, %v1012_v48 }
 0x332   :  { %1013 = vrcp.f32 %v292_v49  ;;  %v304_v53 = vand.u32 2147483648, %v292_v49  ;;  %v302_v55 = vand.u32 2147483647, %v292_v49  ;;  %vm298_vm8 = vweird.f32 %v292_v49 }
 0x333   :  { %1015 = vtanh.f32 %v288_v45 }
 0x334   :  { %v305_v57 = vor.u32 1.1754944e-38, %v304_v53  ;;  %vm303_vm10 = vcmp.eq.f32.partialorder %v302_v55, 8.507059e+37 }
 0x338   :  { %v1014_v50 = vpop.eup %1013 }
 0x339   :  { %v294_v51 = vmul.f32 %v1014_v50, %v292_v49  ;;  %vm299_vm7 = vweird.f32 %v1014_v50  ;;  %v1016_v59 = vpop.eup %1015  ;;  %v418_v49 = vunpack.c.h.bf16 %v341_v16  ;;  %v958_v16 = vld [vmem:[#allocation4 + $0x10] sm:$0xff] }
 0x33a   :  { %vm300_vm9 = vmor %vm298_vm8, %vm299_vm7  ;;  %919 = vmatmul.msk.bf16.gmra.mxu0 %vm111_vm0, %v958_v16 }
 0x33b   :  { %v295_v52 = vsub.f32 1.0, %v294_v51 }
 0x33d   :  { %v296_v54 = vmul.f32 %v1014_v50, %v295_v52 }
 0x33f   :  { %v297_v56 = vadd.f32 %v1014_v50, %v296_v54 }
 0x341   :  { %v301_v58 = vsel %vm300_vm9, %v1014_v50, %v297_v56  ;;  %v419_v50 = vadd.f32 %v1259_v10, %v418_v49 }
 0x342   :  { %v306_v60 = vsel %vm303_vm10, %v305_v57, %v301_v58 }
 0x343   :  { %v309_v61 = vsel %vm177_vm3, %v306_v60, %v1016_v59 }
 0x344   :  { %312 = vrot.lane.b32.xlu2 %v309_v61, %s1175_s4  ;;  %v310_v1 = vmul.f32 %v309_v61, %v245_v36 }
 0x39e   :  { %v313_v62 = vpop.permute.xlu2 %312 }
 0x39f   :  { %v315_v63 = vmul.f32 %v313_v62, %v309_v61 }
 0x3a1   :  { %317 = vrot.lane.b32.xlu2 %v315_v63, %s1175_s4 }
 0x3fb   :  { %v318_v3 = vpop.permute.xlu2 %317 }
 0x3fc   :  { %v320_v5 = vadd.f32 %v318_v3, %v310_v1 }
 0x3fe   :  { %1017 = vtanh.f32 %v320_v5 }
 0x404   :  { %v1018_v6 = vpop.eup %1017 }
 0x405   :  { %323 = vrot.lane.b32.xlu0 %v1018_v6, %s1175_s4 }
 0x477   :  { %v324_v8 = vpop.permute.xlu0 %323 }
 0x478   :  { %v1285_v9 = vmul.f32 %v324_v8, %v309_v61 }
 0x47a   :  { %v344_v11 = vpack.c.bf16 %v1285_v9, %v1285_v9 }
 0x47c   :  { %346 = vrot.lane.b32.xlu1 %v344_v11, %s1170_s9 }
 0x4ee   :  { %v347_v15 = vpop.permute.xlu1 %346 }
 0x4ef   :  { %932 = vmatmul.msk.bf16.vlgmr.msrb.gmra.mxu1 %vm196_vm6, %v347_v15 }
 0x4f0   :  { %661 = vmatpush.bf16.msrb.mxu1 %v1240_v2 }
 0x4f4   :  { %662 = vmatpush.bf16.msrb.mxu1 %v1243_v4 }
 0x56c   :  { %v360_v19 = vpop.f32.mrf.mxu1 }
 0x56d   :  { %v364_v20 = vadd.f32 %v360_v19, %v343_v18 }
 0x56f   :  { %v933_v21 = vmul.f32 -1.442695, %v364_v20 }
 0x571   :  { %1019 = vpow2.f32 %v933_v21 }
 0x574   :  { %v362_v23 = vpop.f32.mrf.mxu1 }
 0x577   :  { %v1020_v24 = vpop.eup %1019 }
 0x578   :  { %v368_v25 = vadd.f32 1.0, %v1020_v24 }
 0x57a   :  { %1021 = vrcp.f32 %v368_v25  ;;  %v380_v29 = vand.u32 2147483648, %v368_v25  ;;  %v378_v31 = vand.u32 2147483647, %v368_v25  ;;  %vm374_vm12 = vweird.f32 %v368_v25 }
 0x57b   :  { %1023 = vtanh.f32 %v364_v20  ;;  %v143_v20 = vpop.f32.mrf.mxu0 }
 0x57c   :  { %v381_v33 = vor.u32 1.1754944e-38, %v380_v29  ;;  %vm379_vm14 = vcmp.eq.f32.partialorder %v378_v31, 8.507059e+37 }
 0x580   :  { %v1022_v26 = vpop.eup %1021 }
 0x581   :  { %v370_v27 = vmul.f32 %v1022_v26, %v368_v25  ;;  %vm375_vm11 = vweird.f32 %v1022_v26  ;;  %v1024_v35 = vpop.eup %1023 }
 0x582   :  { %vm376_vm13 = vmor %vm374_vm12, %vm375_vm11 }
 0x583   :  { %v371_v28 = vsub.f32 1.0, %v370_v27  ;;  %v145_v21 = vpop.f32.mrf.mxu0 }
 0x584   :  { %v978_v23 = vpack.c.bf16 %v145_v21, %v143_v20 }
 0x585   :  { %v372_v30 = vmul.f32 %v1022_v26, %v371_v28 }
 0x586   :  { %986 = vst [vmem:[#allocation2 + $0x10] sm:$0xff] %v978_v23  }
 0x587   :  { %v373_v32 = vadd.f32 %v1022_v26, %v372_v30 }
 0x589   :  { %v377_v34 = vsel %vm376_vm13, %v1022_v26, %v373_v32 }
 0x58a   :  { %v382_v36 = vsel %vm379_vm14, %v381_v33, %v377_v34 }
 0x58b   :  { %v385_v37 = vsel %vm177_vm3, %v382_v36, %v1024_v35 }
 0x58c   :  { %388 = vrot.lane.b32.xlu2 %v385_v37, %s1175_s4  ;;  %v386_v41 = vmul.f32 %v385_v37, %v320_v5 }
 0x58d   :  { %v493_v25 = vld [vmem:[#allocation2 + $0x10] sm:$0xff]  }
 0x58e   :  { %v494_v26 = vunpack.c.l.bf16 %v493_v25 }
 0x590   :  { %v495_v27 = vadd.f32 %v1259_v10, %v494_v26 }
 0x5e6   :  { %v389_v38 = vpop.permute.xlu2 %388 }
 0x5e7   :  { %v391_v40 = vmul.f32 %v389_v38, %v385_v37 }
 0x5e9   :  { %393 = vrot.lane.b32.xlu0 %v391_v40, %s1175_s4 }
 0x65b   :  { %v394_v42 = vpop.permute.xlu0 %393 }
 0x65c   :  { %v396_v43 = vadd.f32 %v394_v42, %v386_v41 }
 0x65e   :  { %1025 = vtanh.f32 %v396_v43 }
 0x664   :  { %v1026_v44 = vpop.eup %1025 }
 0x665   :  { %399 = vrot.lane.b32.xlu1 %v1026_v44, %s1175_s4 }
 0x6d7   :  { %v400_v45 = vpop.permute.xlu1 %399 }
 0x6d8   :  { %v1299_v46 = vmul.f32 %v400_v45, %v385_v37 }
 0x6da   :  { %v420_v47 = vpack.c.bf16 %v1299_v46, %v1299_v46 }
 0x6dc   :  { %422 = vrot.lane.b32.xlu2 %v420_v47, %s1170_s9 }
 0x736   :  { %v423_v48 = vpop.permute.xlu2 %422 }
 0x737   :  { %934 = vmatmul.msk.bf16.vlgmr.msra.gmra.mxu1 %vm196_vm6, %v423_v48 }
 0x7b4   :  { %v436_v51 = vpop.f32.mrf.mxu1 }
 0x7b5   :  { %v440_v52 = vadd.f32 %v436_v51, %v419_v50 }
 0x7b7   :  { %v935_v53 = vmul.f32 -1.442695, %v440_v52 }
 0x7b9   :  { %1027 = vpow2.f32 %v935_v53 }
 0x7bc   :  { %v438_v54 = vpop.f32.mrf.mxu1 }
 0x7bf   :  { %v1028_v55 = vpop.eup %1027 }
 0x7c0   :  { %v444_v56 = vadd.f32 1.0, %v1028_v55 }
 0x7c2   :  { %1029 = vrcp.f32 %v444_v56  ;;  %v456_v60 = vand.u32 2147483648, %v444_v56  ;;  %v454_v62 = vand.u32 2147483647, %v444_v56  ;;  %vm450_vm1 = vweird.f32 %v444_v56 }
 0x7c3   :  { %1031 = vtanh.f32 %v440_v52 }
 0x7c4   :  { %v457_v1 = vor.u32 1.1754944e-38, %v456_v60  ;;  %vm455_vm4 = vcmp.eq.f32.partialorder %v454_v62, 8.507059e+37 }
 0x7c8   :  { %v1030_v57 = vpop.eup %1029 }
 0x7c9   :  { %v446_v58 = vmul.f32 %v1030_v57, %v444_v56  ;;  %vm451_vm15 = vweird.f32 %v1030_v57  ;;  %v1032_v5 = vpop.eup %1031  ;;  %v570_v56 = vunpack.c.h.bf16 %v493_v25  ;;  %v959_v25 = vld [vmem:[#allocation4 + $0x18] sm:$0xff] }
 0x7ca   :  { %vm452_vm2 = vmor %vm450_vm1, %vm451_vm15  ;;  %920 = vmatmul.msk.bf16.gmra.mxu0 %vm111_vm0, %v959_v25 }
 0x7cb   :  { %v447_v59 = vsub.f32 1.0, %v446_v58 }
 0x7cd   :  { %v448_v61 = vmul.f32 %v1030_v57, %v447_v59 }
 0x7cf   :  { %v449_v63 = vadd.f32 %v1030_v57, %v448_v61 }
 0x7d1   :  { %v453_v3 = vsel %vm452_vm2, %v1030_v57, %v449_v63  ;;  %v571_v57 = vadd.f32 %v1259_v10, %v570_v56 }
 0x7d2   :  { %v458_v6 = vsel %vm455_vm4, %v457_v1, %v453_v3 }
 0x7d3   :  { %v461_v7 = vsel %vm177_vm3, %v458_v6, %v1032_v5 }
 0x7d4   :  { %464 = vrot.lane.b32.xlu0 %v461_v7, %s1175_s4  ;;  %v462_v12 = vmul.f32 %v461_v7, %v396_v43 }
 0x846   :  { %v465_v8 = vpop.permute.xlu0 %464 }
 0x847   :  { %v467_v11 = vmul.f32 %v465_v8, %v461_v7 }
 0x849   :  { %469 = vrot.lane.b32.xlu1 %v467_v11, %s1175_s4 }
 0x8bb   :  { %v470_v13 = vpop.permute.xlu1 %469 }
 0x8bc   :  { %v472_v14 = vadd.f32 %v470_v13, %v462_v12 }
 0x8be   :  { %1033 = vtanh.f32 %v472_v14 }
 0x8c4   :  { %v1034_v15 = vpop.eup %1033 }
 0x8c5   :  { %475 = vrot.lane.b32.xlu2 %v1034_v15, %s1175_s4 }
 0x91f   :  { %v476_v17 = vpop.permute.xlu2 %475 }
 0x920   :  { %v1312_v18 = vmul.f32 %v476_v17, %v461_v7 }
 0x922   :  { %v496_v19 = vpack.c.bf16 %v1312_v18, %v1312_v18 }
 0x924   :  { %498 = vrot.lane.b32.xlu0 %v496_v19, %s1170_s9 }
 0x996   :  { %v499_v24 = vpop.permute.xlu0 %498 }
 0x997   :  { %936 = vmatmul.msk.bf16.vlgmr.msrb.gmra.mxu2 %vm196_vm6, %v499_v24 }
 0x998   :  { %737 = vmatpush.bf16.msrb.mxu2 %v1240_v2 }
 0x99c   :  { %738 = vmatpush.bf16.msrb.mxu2 %v1243_v4 }
 0xa1a   :  { %v512_v28 = vpop.f32.mrf.mxu2 }
 0xa1b   :  { %v516_v29 = vadd.f32 %v512_v28, %v495_v27 }
 0xa1d   :  { %v937_v30 = vmul.f32 -1.442695, %v516_v29 }
 0xa1f   :  { %1035 = vpow2.f32 %v937_v30  ;;  %v148_v30 = vpop.f32.mrf.mxu0 }
 0xa22   :  { %v514_v31 = vpop.f32.mrf.mxu2 }
 0xa25   :  { %v1036_v32 = vpop.eup %1035 }
 0xa26   :  { %v520_v33 = vadd.f32 1.0, %v1036_v32 }
 0xa27   :  { %v150_v31 = vpop.f32.mrf.mxu0 }
 0xa28   :  { %1037 = vrcp.f32 %v520_v33  ;;  %v532_v37 = vand.u32 2147483648, %v520_v33  ;;  %v530_v4 = vand.u32 2147483647, %v520_v33  ;;  %vm526_vm7 = vweird.f32 %v520_v33 }
 0xa29   :  { %1039 = vtanh.f32 %v516_v29  ;;  %v983_v32 = vpack.c.bf16 %v150_v31, %v148_v30 }
 0xa2a   :  { %v533_v40 = vor.u32 1.1754944e-38, %v532_v37  ;;  %vm531_vm9 = vcmp.eq.f32.partialorder %v530_v4, 8.507059e+37 }
 0xa2b   :  { %987 = vst [vmem:[#allocation2 + $0x18] sm:$0xff] %v983_v32  }
 0xa2e   :  { %v1038_v34 = vpop.eup %1037 }
 0xa2f   :  { %v522_v35 = vmul.f32 %v1038_v34, %v520_v33  ;;  %vm527_vm5 = vweird.f32 %v1038_v34  ;;  %v1040_v42 = vpop.eup %1039 }
 0xa30   :  { %vm528_vm8 = vmor %vm526_vm7, %vm527_vm5 }
 0xa31   :  { %v523_v36 = vsub.f32 1.0, %v522_v35 }
 0xa32   :  { %v645_v33 = vld [vmem:[#allocation2 + $0x18] sm:$0xff]  }
 0xa33   :  { %v524_v2 = vmul.f32 %v1038_v34, %v523_v36 }
 0xa35   :  { %v525_v38 = vadd.f32 %v1038_v34, %v524_v2 }
 0xa37   :  { %v529_v41 = vsel %vm528_vm8, %v1038_v34, %v525_v38  ;;  %v646_v34 = vunpack.c.l.bf16 %v645_v33 }
 0xa38   :  { %v534_v43 = vsel %vm531_vm9, %v533_v40, %v529_v41 }
 0xa39   :  { %v537_v44 = vsel %vm177_vm3, %v534_v43, %v1040_v42  ;;  %v647_v35 = vadd.f32 %v1259_v10, %v646_v34 }
 0xa3a   :  { %540 = vrot.lane.b32.xlu1 %v537_v44, %s1175_s4  ;;  %v538_v48 = vmul.f32 %v537_v44, %v472_v14 }
 0xaac   :  { %v541_v45 = vpop.permute.xlu1 %540 }
 0xaad   :  { %v543_v47 = vmul.f32 %v541_v45, %v537_v44 }
 0xaaf   :  { %545 = vrot.lane.b32.xlu2 %v543_v47, %s1175_s4 }
 0xb09   :  { %v546_v49 = vpop.permute.xlu2 %545 }
 0xb0a   :  { %v548_v50 = vadd.f32 %v546_v49, %v538_v48 }
 0xb0c   :  { %1041 = vtanh.f32 %v548_v50 }
 0xb12   :  { %v1042_v51 = vpop.eup %1041 }
 0xb13   :  { %551 = vrot.lane.b32.xlu0 %v1042_v51, %s1175_s4 }
 0xb85   :  { %v552_v52 = vpop.permute.xlu0 %551 }
 0xb86   :  { %v1326_v53 = vmul.f32 %v552_v52, %v537_v44 }
 0xb88   :  { %v572_v54 = vpack.c.bf16 %v1326_v53, %v1326_v53 }
 0xb8a   :  { %574 = vrot.lane.b32.xlu1 %v572_v54, %s1170_s9 }
 0xbfc   :  { %v575_v55 = vpop.permute.xlu1 %574 }
 0xbfd   :  { %938 = vmatmul.msk.bf16.vlgmr.msra.gmra.mxu2 %vm196_vm6, %v575_v55 }
 0xc80   :  { %v588_v58 = vpop.f32.mrf.mxu2 }
 0xc81   :  { %v592_v59 = vadd.f32 %v588_v58, %v571_v57 }
 0xc83   :  { %v939_v60 = vmul.f32 -1.442695, %v592_v59 }
 0xc85   :  { %1043 = vpow2.f32 %v939_v60 }
 0xc88   :  { %v590_v61 = vpop.f32.mrf.mxu2 }
 0xc8b   :  { %v1044_v62 = vpop.eup %1043 }
 0xc8c   :  { %v596_v63 = vadd.f32 1.0, %v1044_v62 }
 0xc8e   :  { %1045 = vrcp.f32 %v596_v63  ;;  %v608_v6 = vand.u32 2147483648, %v596_v63  ;;  %v606_v8 = vand.u32 2147483647, %v596_v63  ;;  %vm602_vm11 = vweird.f32 %v596_v63 }
 0xc8f   :  { %1047 = vtanh.f32 %v592_v59 }
 0xc90   :  { %v609_v12 = vor.u32 1.1754944e-38, %v608_v6  ;;  %vm607_vm13 = vcmp.eq.f32.partialorder %v606_v8, 8.507059e+37 }
 0xc94   :  { %v1046_v1 = vpop.eup %1045 }
 0xc95   :  { %v598_v3 = vmul.f32 %v1046_v1, %v596_v63  ;;  %vm603_vm10 = vweird.f32 %v1046_v1  ;;  %v1048_v14 = vpop.eup %1047 }
 0xc96   :  { %vm604_vm12 = vmor %vm602_vm11, %vm603_vm10 }
 0xc97   :  { %v599_v5 = vsub.f32 1.0, %v598_v3 }
 0xc99   :  { %v600_v7 = vmul.f32 %v1046_v1, %v599_v5 }
 0xc9b   :  { %v601_v11 = vadd.f32 %v1046_v1, %v600_v7  ;;  %v722_v7 = vunpack.c.h.bf16 %v645_v33 }
 0xc9d   :  { %v605_v13 = vsel %vm604_vm12, %v1046_v1, %v601_v11  ;;  %v1361_v1 = vld [vmem:[%s1428_s1] sm:$0xff]  ;;  %v723_v8 = vadd.f32 %v1259_v10, %v722_v7 }
 0xc9e   :  { %v610_v15 = vsel %vm607_vm13, %v609_v12, %v605_v13  ;;  %vm252_vm2 = vcmp.gt.s32.totalorder %v1361_v1, 0  ;;  %vm631_vm4 = vcmp.gt.s32.totalorder %v1361_v1, 5  ;;  %vm327_vm10 = vcmp.gt.s32.totalorder %v1361_v1, 1 }
 0xc9f   :  { %v613_v16 = vsel %vm177_vm3, %v610_v15, %v1048_v14  ;;  %v253_v3 = vsel %vm252_vm2, 1, %v1174_v0  ;;  %v632_v5 = vsel %vm631_vm4, 1, %v1174_v0  ;;  %v328_v31 = vsel %vm327_vm10, 1, %v1174_v0 }
 0xca0   :  { %616 = vrot.lane.b32.xlu2 %v613_v16, %s1175_s4  ;;  %v614_v20 = vmul.f32 %v613_v16, %v548_v50  ;;  %vm479_vm11 = vcmp.gt.s32.totalorder %v1361_v1, 3  ;;  %vm403_vm13 = vcmp.gt.s32.totalorder %v1361_v1, 2 }
 0xca1   :  { %v480_v32 = vsel %vm479_vm11, 1, %v1174_v0 }
 0xcfa   :  { %v617_v17 = vpop.permute.xlu2 %616 }
 0xcfb   :  { %v619_v19 = vmul.f32 %v617_v17, %v613_v16 }
 0xcfd   :  { %621 = vrot.lane.b32.xlu0 %v619_v19, %s1175_s4 }
 0xd6f   :  { %v622_v21 = vpop.permute.xlu0 %621 }
 0xd70   :  { %v624_v23 = vadd.f32 %v622_v21, %v614_v20 }
 0xd72   :  { %1049 = vtanh.f32 %v624_v23 }
 0xd78   :  { %v1050_v24 = vpop.eup %1049 }
 0xd79   :  { %627 = vrot.lane.b32.xlu1 %v1050_v24, %s1175_s4 }
 0xdeb   :  { %v628_v26 = vpop.permute.xlu1 %627 }
 0xdec   :  { %v1339_v27 = vmul.f32 %v628_v26, %v613_v16 }
 0xdee   :  { %v648_v28 = vpack.c.bf16 %v1339_v27, %v1339_v27 }
 0xdf0   :  { %650 = vrot.lane.b32.xlu2 %v648_v28, %s1170_s9 }
 0xe4a   :  { %v651_v29 = vpop.permute.xlu2 %650 }
 0xe4b   :  { %940 = vmatmul.msk.bf16.vlgmr.msrb.gmra.mxu1 %vm196_vm6, %v651_v29 }
 0xec8   :  { %v664_v36 = vpop.f32.mrf.mxu1 }
 0xec9   :  { %v668_v37 = vadd.f32 %v664_v36, %v647_v35 }
 0xecb   :  { %v941_v2 = vmul.f32 -1.442695, %v668_v37 }
 0xecd   :  { %1051 = vpow2.f32 %v941_v2  ;;  %v404_v2 = vsel %vm403_vm13, 1, %v1174_v0 }
 0xed0   :  { %v666_v4 = vpop.f32.mrf.mxu1 }
 0xed3   :  { %v1052_v38 = vpop.eup %1051 }
 0xed4   :  { %v672_v40 = vadd.f32 1.0, %v1052_v38 }
 0xed6   :  { %1053 = vrcp.f32 %v672_v40  ;;  %v684_v44 = vand.u32 2147483648, %v672_v40  ;;  %v682_v47 = vand.u32 2147483647, %v672_v40  ;;  %vm678_vm14 = vweird.f32 %v672_v40 }
 0xed7   :  { %1055 = vtanh.f32 %v668_v37 }
 0xed8   :  { %v685_v49 = vor.u32 1.1754944e-38, %v684_v44  ;;  %vm683_vm1 = vcmp.eq.f32.partialorder %v682_v47, 8.507059e+37 }
 0xedc   :  { %v1054_v41 = vpop.eup %1053 }
 0xedd   :  { %v674_v42 = vmul.f32 %v1054_v41, %v672_v40  ;;  %vm679_vm0 = vweird.f32 %v1054_v41  ;;  %v1056_v51 = vpop.eup %1055 }
 0xede   :  { %vm680_vm15 = vmor %vm678_vm14, %vm679_vm0  ;;  %vm555_vm0 = vcmp.gt.s32.totalorder %v1361_v1, 4 }
 0xedf   :  { %v675_v43 = vsub.f32 1.0, %v674_v42  ;;  %v556_v4 = vsel %vm555_vm0, 1, %v1174_v0 }
 0xee1   :  { %v676_v45 = vmul.f32 %v1054_v41, %v675_v43 }
 0xee3   :  { %v677_v48 = vadd.f32 %v1054_v41, %v676_v45  ;;  %v963_v45 = vld [vmem:[#allocation9] sm:$0xff] }
 0xee5   :  { %v681_v50 = vsel %vm680_vm15, %v1054_v41, %v677_v48 }
 0xee6   :  { %v686_v52 = vsel %vm683_vm1, %v685_v49, %v681_v50  ;;  %vm783_vm1 = vcmp.gt.s32.totalorder %v1361_v1, 7 }
 0xee7   :  { %v689_v54 = vsel %vm177_vm3, %v686_v52, %v1056_v51  ;;  %v784_v43 = vsel %vm783_vm1, 1, %v1174_v0 }
 0xee8   :  { %692 = vrot.lane.b32.xlu0 %v689_v54, %s1175_s4  ;;  %v690_v57 = vmul.f32 %v689_v54, %v624_v23 }
 0xf5a   :  { %v693_v55 = vpop.permute.xlu0 %692 }
 0xf5b   :  { %v695_v56 = vmul.f32 %v693_v55, %v689_v54 }
 0xf5d   :  { %697 = vrot.lane.b32.xlu1 %v695_v56, %s1175_s4 }
 0xfcf   :  { %v698_v58 = vpop.permute.xlu1 %697 }
 0xfd0   :  { %v1350_v59 = vadd.f32 %v698_v58, %v690_v57 }
 0xfd2   :  { %1057 = vtanh.f32 %v1350_v59 }
 0xfd8   :  { %v1058_v60 = vpop.eup %1057 }
 0xfd9   :  { %703 = vrot.lane.b32.xlu2 %v1058_v60, %s1175_s4 }
0x1033   :  { %v704_v61 = vpop.permute.xlu2 %703 }
0x1034   :  { %v1354_v62 = vmul.f32 %v704_v61, %v689_v54 }
0x1036   :  { %v724_v63 = vpack.c.bf16 %v1354_v62, %v1354_v62 }
0x1038   :  { %726 = vrot.lane.b32.xlu0 %v724_v63, %s1170_s9 }
0x1040   :  { %255 = vperm.xlu0 %998, %v253_v3  }
0x1048   :  { %634 = vperm.xlu0 %998, %v632_v5  }
0x10aa   :  { %v727_v6 = vpop.permute.xlu0 %726 }
0x10ab   :  { %942 = vmatmul.msk.bf16.vlgmr.msrb.gmra.mxu2 %vm196_vm6, %v727_v6 }
0x10b2   :  { %v256_v33 = vpop.permute.xlu0 %255 }
0x10b3   :  { %vm257_vm12 = vcmp.eq.s32.totalorder %v256_v33, 1 }
0x10b4   :  { %v258_v34 = vsel %vm257_vm12, %v1270_v39, 0.0 }
0x10ba   :  { %v635_v54 = vpop.permute.xlu0 %634 }
0x112e   :  { %v740_v11 = vpop.f32.mrf.mxu2 }
0x112f   :  { %v744_v12 = vadd.f32 %v740_v11, %v723_v8 }
0x1131   :  { %v943_v13 = vmul.f32 -1.442695, %v744_v12 }
0x1133   :  { %1059 = vpow2.f32 %v943_v13  ;;  %v1002_v13 = vld [vmem:[%s1433_s6] ss:$0 sm:$0xff]  ;;  %s1176_s6 = smov [#allocation10]  }
0x1134   :  { %s881_s21 = sshll.u32 %s1176_s6, 4  ;;  %s882_s21 = int_to_ptr.vmem [resolvable:$true] %s881_s21 }
0x1136   :  { %v742_v14 = vpop.f32.mrf.mxu2 }
0x1139   :  { %v1060_v15 = vpop.eup %1059 }
0x113a   :  { %v748_v16 = vadd.f32 1.0, %v1060_v15 }
0x113c   :  { %1061 = vrcp.f32 %v748_v16  ;;  %v760_v21 = vand.u32 2147483648, %v748_v16  ;;  %v758_v24 = vand.u32 2147483647, %v748_v16  ;;  %vm754_vm7 = vweird.f32 %v748_v16 }
0x113d   :  { %1063 = vtanh.f32 %v744_v12 }
0x113e   :  { %v761_v10 = vor.u32 1.1754944e-38, %v760_v21  ;;  %vm759_vm9 = vcmp.eq.f32.partialorder %v758_v24, 8.507059e+37 }
0x1142   :  { %v1062_v17 = vpop.eup %1061 }
0x1143   :  { %v750_v19 = vmul.f32 %v1062_v17, %v748_v16  ;;  %vm755_vm5 = vweird.f32 %v1062_v17  ;;  %v1064_v28 = vpop.eup %1063 }
0x1144   :  { %vm756_vm8 = vmor %vm754_vm7, %vm755_vm5  ;;  %vm636_vm7 = vcmp.eq.s32.totalorder %v635_v54, 1 }
0x1145   :  { %v751_v20 = vsub.f32 1.0, %v750_v19  ;;  %v637_v56 = vsel %vm636_vm7, %v1339_v27, 0.0 }
0x1147   :  { %v752_v23 = vmul.f32 %v1062_v17, %v751_v20 }
0x1149   :  { %v753_v25 = vadd.f32 %v1062_v17, %v752_v23 }
0x114b   :  { %v757_v26 = vsel %vm756_vm8, %v1062_v17, %v753_v25 }
0x114c   :  { %v762_v29 = vsel %vm759_vm9, %v761_v10, %v757_v26 }
0x114d   :  { %v1372_v30 = vsel %vm177_vm3, %v762_v29, %v1064_v28  ;;  %vm707_vm3 = vcmp.gt.s32.totalorder %v1361_v1, 6 }
0x114e   :  { %768 = vrot.lane.b32.xlu1 %v1372_v30, %s1175_s4  ;;  %v708_v22 = vsel %vm707_vm3, 1, %v1174_v0  ;;  %v766_v47 = vmul.f32 %v1372_v30, %v1350_v59 }
0x1156   :  { %330 = vperm.xlu1 %999, %v328_v31  }
0x115e   :  { %482 = vperm.xlu1 %999, %v480_v32  }
0x1166   :  { %260 = vrot.lane.b32.xlu1 %v258_v34, %s1170_s9 }
0x116e   :  { %710 = vperm.xlu1 %999, %v708_v22  }
0x11c0   :  { %v769_v35 = vpop.permute.xlu1 %768 }
0x11c1   :  { %v771_v36 = vmul.f32 %v769_v35, %v1372_v30 }
0x11c3   :  { %773 = vrot.lane.b32.xlu2 %v771_v36, %s1175_s4 }
0x11c8   :  { %v331_v37 = vpop.permute.xlu1 %330 }
0x11c9   :  { %vm332_vm15 = vcmp.eq.s32.totalorder %v331_v37, 1 }
0x11ca   :  { %v333_v41 = vsel %vm332_vm15, %v1285_v9, 0.0 }
0x11cb   :  { %406 = vperm.xlu2 %1000, %v404_v2  }
0x11d0   :  { %v483_v39 = vpop.permute.xlu1 %482 }
0x11d1   :  { %vm484_vm14 = vcmp.eq.s32.totalorder %v483_v39, 1 }
0x11d2   :  { %v485_v38 = vsel %vm484_vm14, %v1312_v18, 0.0  ;;  %v964_v18 = vld [vmem:[#allocation9 + $0x8] sm:$0xff] }
0x11d3   :  { %558 = vperm.xlu2 %1000, %v556_v4   ;;  %487 = vrot.lane.b32.xlu1 %v485_v38, %s1170_s9 }
0x11d4   :  { %846 = vmatpush.bf16.msra.mxu3 %v964_v18 }
0x11d8   :  { %v261_v40 = vpop.permute.xlu1 %260  ;;  %847 = vmatpush.bf16.msra.mxu3 %v963_v45 }
0x11d9   :  { %263 = vst.msk [vmem:[#allocation3] sm:$0xff] %vm196_vm6, %v261_v40 }
0x11db   :  { %335 = vrot.lane.b32.xlu2 %v333_v41, %s1170_s9 }
0x11e0   :  { %v711_v42 = vpop.permute.xlu1 %710  ;;  %v796_v57 = vld [vmem:[#allocation3] sm:$0xff] }
0x11e1   :  { %vm712_vm2 = vcmp.eq.s32.totalorder %v711_v42, 1 }
0x11e2   :  { %v713_v44 = vsel %vm712_vm2, %v1354_v62, 0.0 }
0x11e3   :  { %715 = vrot.lane.b32.xlu1 %v713_v44, %s1170_s9  ;;  %786 = vperm.xlu2 %1000, %v784_v43  }
0x121d   :  { %v774_v9 = vpop.permute.xlu2 %773 }
0x121e   :  { %v776_v48 = vadd.f32 %v774_v9, %v766_v47 }
0x1220   :  { %1065 = vtanh.f32 %v776_v48 }
0x1225   :  { %v407_v49 = vpop.permute.xlu2 %406 }
0x1226   :  { %v1066_v50 = vpop.eup %1065  ;;  %vm408_vm4 = vcmp.eq.s32.totalorder %v407_v49, 1 }
0x1227   :  { %779 = vrot.lane.b32.xlu0 %v1066_v50, %s1175_s4  ;;  %v409_v51 = vsel %vm408_vm4, %v1299_v46, 0.0 }
0x122d   :  { %v559_v0 = vpop.permute.xlu2 %558 }
0x122e   :  { %vm560_vm5 = vcmp.eq.s32.totalorder %v559_v0, 1 }
0x122f   :  { %411 = vrot.lane.b32.xlu0 %v409_v51, %s1170_s9  ;;  %v561_v52 = vsel %vm560_vm5, %v1326_v53, 0.0 }
0x1230   :  { %563 = vrot.lane.b32.xlu2 %v561_v52, %s1170_s9 }
0x1235   :  { %v336_v55 = vpop.permute.xlu2 %335 }
0x1236   :  { %339 = vst.msk [vmem:[#allocation3 + $0x8] sm:$0xff] %vm196_vm6, %v336_v55 }
0x1237   :  { %639 = vrot.lane.b32.xlu0 %v637_v56, %s1170_s9 }
0x123d   :  { %v797_v58 = vld [vmem:[#allocation3 + $0x8] sm:$0xff]  ;;  %v787_v60 = vpop.permute.xlu2 %786 }
0x123e   :  { %v804_v59 = vpack.c.bf16 %v797_v58, %v796_v57  ;;  %vm788_vm8 = vcmp.eq.s32.totalorder %v787_v60, 1 }
0x1240   :  { %952 = vmatmul.msk.bf16.vlgmr.msra.gmra.mxu3 %vm196_vm6, %v804_v59 }
0x1245   :  { %v488_v46 = vpop.permute.xlu1 %487 }
0x1246   :  { %491 = vst.msk [vmem:[#allocation3 + $0x18] sm:$0xff] %vm196_vm6, %v488_v46 }
0x124d   :  { %v799_v6 = vld [vmem:[#allocation3 + $0x18] sm:$0xff] }
0x1255   :  { %v716_v53 = vpop.permute.xlu1 %715 }
0x1256   :  { %719 = vst.msk [vmem:[#allocation3 + $0x30] sm:$0xff] %vm196_vm6, %v716_v53 }
0x125d   :  { %v802_v20 = vld [vmem:[#allocation3 + $0x30] sm:$0xff] }
0x128a   :  { %v564_v61 = vpop.permute.xlu2 %563 }
0x128b   :  { %567 = vst.msk [vmem:[#allocation3 + $0x20] sm:$0xff] %vm196_vm6, %v564_v61 }
0x1292   :  { %v800_v11 = vld [vmem:[#allocation3 + $0x20] sm:$0xff] }
0x1299   :  { %v780_v62 = vpop.permute.xlu0 %779 }
0x129a   :  { %v782_v27 = vmul.f32 %v780_v62, %v1372_v30 }
0x129c   :  { %v789_v63 = vsel %vm788_vm8, %v782_v27, 0.0 }
0x129d   :  { %791 = vrot.lane.b32.xlu2 %v789_v63, %s1170_s9 }
0x12a1   :  { %v412_v1 = vpop.permute.xlu0 %411 }
0x12a2   :  { %415 = vst.msk [vmem:[#allocation3 + $0x10] sm:$0xff] %vm196_vm6, %v412_v1 }
0x12a9   :  { %v640_v3 = vpop.permute.xlu0 %639  ;;  %v798_v5 = vld [vmem:[#allocation3 + $0x10] sm:$0xff] }
0x12aa   :  { %643 = vst.msk [vmem:[#allocation3 + $0x28] sm:$0xff] %vm196_vm6, %v640_v3  ;;  %v805_v7 = vpack.c.bf16 %v799_v6, %v798_v5 }
0x12ac   :  { %953 = vmatmul.msk.bf16.gmra.mxu3 %vm196_vm6, %v805_v7 }
0x12b1   :  { %v801_v8 = vld [vmem:[#allocation3 + $0x28] sm:$0xff] }
0x12b2   :  { %v806_v12 = vpack.c.bf16 %v801_v8, %v800_v11 }
0x12bc   :  { %954 = vmatmul.msk.bf16.gmra.mxu3 %vm196_vm6, %v806_v12 }
0x12c3   :  { %v849_v14 = vpop.f32.mrf.mxu3 }
0x12c4   :  { %v850_v15 = vadd.f32 %v1002_v13, %v849_v14 }
0x12c6   :  { %869 = vst [vmem:[#allocation10] sm:$0xff] %v850_v15 }
0x12cb   :  { %v851_v16 = vpop.f32.mrf.mxu3 }
0x12cc   :  { %v852_v17 = vadd.f32 %v1002_v13, %v851_v16 }
0x12ce   :  { %870 = vst [vmem:[#allocation10 + $0x8] sm:$0xff] %v852_v17 }
0x12f7   :  { %v792_v19 = vpop.permute.xlu2 %791 }
0x12f8   :  { %795 = vst.msk [vmem:[#allocation3 + $0x38] sm:$0xff] %vm196_vm6, %v792_v19 }
0x12ff   :  { %v803_v21 = vld [vmem:[#allocation3 + $0x38] sm:$0xff] }
0x1300   :  { %v807_v23 = vpack.c.bf16 %v803_v21, %v802_v20 }
0x1302   :  { %955 = vmatmul.msk.bf16.gmra.mxu3 %vm196_vm6, %v807_v23 }
0x132f   :  { %v854_v24 = vpop.f32.mrf.mxu3 }
0x1330   :  { %v855_v25 = vadd.f32 %v1002_v13, %v854_v24 }
0x1332   :  { %871 = vst [vmem:[#allocation10 + $0x10] sm:$0xff] %v855_v25 }
0x1337   :  { %v856_v10 = vpop.f32.mrf.mxu3 }
0x1338   :  { %v857_v26 = vadd.f32 %v1002_v13, %v856_v10 }
0x133a   :  { %872 = vst [vmem:[#allocation10 + $0x18] sm:$0xff] %v857_v26 }
0x133f   :  { %v859_v28 = vpop.f32.mrf.mxu3 }
0x1340   :  { %v860_v29 = vadd.f32 %v1002_v13, %v859_v28 }
0x1342   :  { %873 = vst [vmem:[#allocation10 + $0x20] sm:$0xff] %v860_v29 }
0x1347   :  { %v861_v30 = vpop.f32.mrf.mxu3 }
0x1348   :  { %v862_v31 = vadd.f32 %v1002_v13, %v861_v30 }
0x134a   :  { %874 = vst [vmem:[#allocation10 + $0x28] sm:$0xff] %v862_v31 }
0x1385   :  { %v864_v32 = vpop.f32.mrf.mxu3 }
0x1386   :  { %v865_v33 = vadd.f32 %v1002_v13, %v864_v32 }
0x1388   :  { %875 = vst [vmem:[#allocation10 + $0x30] sm:$0xff] %v865_v33 }
0x138d   :  { %v866_v34 = vpop.f32.mrf.mxu3 }
0x138e   :  { %v867_v22 = vadd.f32 %v1002_v13, %v866_v34 }
0x1390   :  { %876 = vst [vmem:[#allocation10 + $0x38] sm:$0xff] %v867_v22 }
0x1391   :  { %889 = dma.vmem_to_hbm [thread:$0]  %s882_s21, 1024, %s884_s24, [#allocation6], %s1177_s25, %s1177_s25, %s1178_s26  }
0x1392   :  { %1167 = dma.done.wait [#allocation6], 1024  }
0x1393   :  { %1168 = vsyncadd [#allocation6], 4294966272 }
0x1394   :  { %894 = vsyncpa [#allocation5], 1 }
0x1395   :  { %895 = vsyncpa [#allocation8], 1 }
0x1396   :  { %896 = vsyncpa [#allocation6], 1 }

</bundles_post_ra>
